<compile_context>
chip_gen: v6e
topology: v6e:2x2x1
jax: 0.10.0
libtpu: 0.0.40
codegen_flags: <defaults>
</compile_context>

<pallas_src>
import functools

import jax
import jax.numpy as jnp
from jax import lax
from jax.experimental import pallas as pl
from jax.experimental.pallas import tpu as pltpu

F32 = jnp.float32
BF16 = jnp.bfloat16
LANE = 128


def _rup(n, m=LANE):
    return ((n + m - 1) // m) * m


# ---------------------------------------------------------------------------
# Kernel 1: fused GNN stack (all layers).  grid=(L,), state carried in the
# VMEM-resident output block (constant index_map == accumulator pattern).
# ---------------------------------------------------------------------------
def _gnn_kernel(x0_ref, e_ref, src_ref, dst_ref, bid_ref, nid_ref,
                invb_ref, invn_ref, gw_ref, gb_ref, uw_ref, ub_ref,
                x_out_ref, sub_out_ref, *, eps, res):
    l = pl.program_id(0)
    L = pl.num_programs(0)
    M, D = x0_ref.shape
    E = e_ref.shape[0]
    BP = invb_ref.shape[0]
    N = invn_ref.shape[0]

    bid = bid_ref[...]                                    # [M, 1] int32
    nid = nid_ref[...]                                    # [M, 1] int32

    @pl.when(l == 0)
    def _init():
        x_out_ref[...] = x0_ref[...]

    # ---- inter-patch step (layers 1..L-1): subgraph mean -> U MLP + residual
    #      -> per-node mean redistribution (gather/scatter as one-hot matmuls)
    @pl.when(l > 0)
    def _interpatch():
        x = x_out_ref[...]                                # [M, D] f32
        b_oh = (bid == lax.broadcasted_iota(jnp.int32, (M, BP), 1)).astype(BF16)
        seg_mean = lax.dot_general(
            b_oh, x.astype(BF16), (((0,), (0,)), ((), ())),
            preferred_element_type=F32) * invb_ref[...]                # [BP, D]
        sub = jnp.dot(b_oh, seg_mean.astype(BF16),
                      preferred_element_type=F32)                      # [M, D]
        u = jnp.dot(sub.astype(BF16), uw_ref[0].astype(BF16),
                    preferred_element_type=F32) + ub_ref[0]
        x = x + jax.nn.relu(u)      # U = MLP(nlayer=1, final act); BN identity
        n_oh = (nid == lax.broadcasted_iota(jnp.int32, (M, N), 1)).astype(BF16)
        node_mean = lax.dot_general(
            n_oh, x.astype(BF16), (((0,), (0,)), ((), ())),
            preferred_element_type=F32) * invn_ref[...]                # [N, D]
        x_out_ref[...] = jnp.dot(n_oh, node_mean.astype(BF16),
                                 preferred_element_type=F32)           # [M, D]

    # ---- GINE-style conv + update MLP (BN identity) + ReLU + residual ----
    x = x_out_ref[...]
    src_oh = (src_ref[...] == lax.broadcasted_iota(jnp.int32, (E, M), 1)).astype(BF16)
    dst_oh = (dst_ref[...] == lax.broadcasted_iota(jnp.int32, (E, M), 1)).astype(BF16)
    x_src = jnp.dot(src_oh, x.astype(BF16), preferred_element_type=F32)    # gather
    msg = jax.nn.relu(x_src + e_ref[...])                                  # [E, D]
    agg = lax.dot_general(dst_oh, msg.astype(BF16), (((0,), (0,)), ((), ())),
                          preferred_element_type=F32)                      # scatter-add
    h = (1.0 + eps) * x + agg
    h = jnp.dot(h.astype(BF16), gw_ref[0].astype(BF16),
                preferred_element_type=F32) + gb_ref[0]
    h = jax.nn.relu(h)
    if res:
        h = h + x
    x_out_ref[...] = h

    # ---- after the last layer: per-subgraph (patch) mean pooling ----
    @pl.when(l == L - 1)
    def _finalize():
        xf = x_out_ref[...]
        b_oh = (bid == lax.broadcasted_iota(jnp.int32, (M, BP), 1)).astype(BF16)
        sub_out_ref[...] = lax.dot_general(
            b_oh, xf.astype(BF16), (((0,), (0,)), ((), ())),
            preferred_element_type=F32) * invb_ref[...]


def gnn_forward(x, e, src, dst, bid, nid, invb, invn, gw, gb, uw, ub,
                eps=0.0, res=True):
    M, D = x.shape
    E = e.shape[0]
    BP = invb.shape[0]
    N = invn.shape[0]
    L = gw.shape[0]

    def const(shape):
        return pl.BlockSpec(shape, lambda l, _n=len(shape): (0,) * _n)

    def per_layer(shape):
        return pl.BlockSpec(shape, lambda l, _n=len(shape): (l,) + (0,) * (_n - 1))

    return pl.pallas_call(
        functools.partial(_gnn_kernel, eps=eps, res=res),
        out_shape=(jax.ShapeDtypeStruct((M, D), F32),
                   jax.ShapeDtypeStruct((BP, D), F32)),
        grid=(L,),
        in_specs=[const((M, D)), const((E, D)), const((E, 1)), const((E, 1)),
                  const((M, 1)), const((M, 1)), const((BP, 1)), const((N, 1)),
                  per_layer((1, D, D)), per_layer((1, 1, D)),
                  per_layer((1, D, D)), per_layer((1, 1, D))],
        out_specs=(const((M, D)), const((BP, D))),
        compiler_params=pltpu.CompilerParams(dimension_semantics=("arbitrary",)),
    )(x, e, src, dst, bid, nid, invb, invn, gw, gb, uw, ub)


# ---------------------------------------------------------------------------
# Kernel 2: fused MLP-Mixer stack.  grid=(B, L), B parallel (v7x megacore),
# L arbitrary; x carried in the output block for each b.
# ---------------------------------------------------------------------------
def _mixer_kernel(x_ref, m_ref, g1_ref, b1_ref, wt1_ref, bt1_ref, wt2_ref,
                  bt2_ref, g2_ref, b2_ref, wc1_ref, bc1_ref, wc2_ref, bc2_ref,
                  o_ref, *, nh):
    l = pl.program_id(1)

    @pl.when(l == 0)
    def _init():
        o_ref[...] = x_ref[...]

    x = o_ref[0]                                          # [p, D] f32
    msk = m_ref[0]                                        # [p, 1] f32 (1 = valid)
    P, D = x.shape
    chan = (lax.broadcasted_iota(jnp.int32, (1, D), 1) < nh).astype(F32)
    inv_nh = 1.0 / float(nh)

    def ln(v, g, b):
        # padded lanes of v are exactly 0 => full-lane sums == valid-lane sums
        mu = jnp.sum(v, axis=-1, keepdims=True) * inv_nh
        var = jnp.maximum(jnp.sum(v * v, axis=-1, keepdims=True) * inv_nh - mu * mu, 0.0)
        return (v - mu) * lax.rsqrt(var + 1e-5) * g + b   # g, b zero-padded

    # ---- token mixing (masked patches excluded from the mix) ----
    y = ln(x, g1_ref[0], b1_ref[0]) * msk                 # [p, D]
    h = lax.dot_general(y.astype(BF16), wt1_ref[0].astype(BF16),
                        (((0,), (0,)), ((), ())),
                        preferred_element_type=F32) + bt1_ref[0]        # [D, TH]
    h = jax.nn.gelu(h, approximate=True)
    tok = lax.dot_general(wt2_ref[0].astype(BF16), h.astype(BF16),
                          (((0,), (1,)), ((), ())),
                          preferred_element_type=F32) + bt2_ref[0]      # [p, D]
    x = x + tok * chan                                    # keep padded lanes at 0

    # ---- channel mixing ----
    y = ln(x, g2_ref[0], b2_ref[0])
    h = jnp.dot(y.astype(BF16), wc1_ref[0].astype(BF16),
                preferred_element_type=F32) + bc1_ref[0]                # [p, CH]
    h = jax.nn.gelu(h, approximate=True)
    h = jnp.dot(h.astype(BF16), wc2_ref[0].astype(BF16),
                preferred_element_type=F32) + bc2_ref[0]                # [p, D]
    o_ref[0] = x + h


def mixer_forward(x, mask, mp, nh):
    B, p, D = x.shape
    L = mp["g1"].shape[0]
    TH = mp["wt1"].shape[2]
    CH = mp["wc1"].shape[2]

    def xb(shape):
        return pl.BlockSpec(shape, lambda b, l: (b, 0, 0))

    def wl(shape):
        return pl.BlockSpec(shape, lambda b, l: (l, 0, 0))

    return pl.pallas_call(
        functools.partial(_mixer_kernel, nh=nh),
        out_shape=jax.ShapeDtypeStruct((B, p, D), F32),
        grid=(B, L),
        in_specs=[xb((1, p, D)), xb((1, p, 1)),
                  wl((1, 1, D)), wl((1, 1, D)),
                  wl((1, p, TH)), wl((1, 1, TH)),
                  wl((1, TH, p)), wl((1, p, 1)),
                  wl((1, 1, D)), wl((1, 1, D)),
                  wl((1, D, CH)), wl((1, 1, CH)),
                  wl((1, CH, D)), wl((1, 1, D))],
        out_specs=xb((1, p, D)),
        compiler_params=pltpu.CompilerParams(
            dimension_semantics=("parallel", "arbitrary")),
    )(x, mask, mp["g1"], mp["b1"], mp["wt1"], mp["bt1"], mp["wt2"], mp["bt2"],
      mp["g2"], mp["b2"], mp["wc1"], mp["bc1"], mp["wc2"], mp["bc2"])


# ---------------------------------------------------------------------------
# Kernel 3: fused tail.  mixer gather + node segment-mean + root gather +
# 2-layer decoder.  The concat([x, mixer]) is realized by splitting dec_w1
# into two D-wide halves (segment-mean is channel-wise, so mean(concat) ==
# concat(mean)); this keeps every tile 128-lane dense and avoids a concat.
# ---------------------------------------------------------------------------
def _tail_kernel(x_ref, mix_ref, bid_ref, nid_ref, rid_ref, invn_ref,
                 w1a_ref, w1b_ref, b1_ref, w2_ref, b2_ref, o_ref):
    x = x_ref[...]                                        # [M, D] f32
    M, D = x.shape
    BP = mix_ref.shape[0]
    N = invn_ref.shape[0]
    R = rid_ref.shape[0]

    b_oh = (bid_ref[...] == lax.broadcasted_iota(jnp.int32, (M, BP), 1)).astype(BF16)
    xm = jnp.dot(b_oh, mix_ref[...].astype(BF16),
                 preferred_element_type=F32)              # mixer_x[batch_x]  [M, D]

    n_oh = (nid_ref[...] == lax.broadcasted_iota(jnp.int32, (M, N), 1)).astype(BF16)
    mean_x = lax.dot_general(n_oh, x.astype(BF16), (((0,), (0,)), ((), ())),
                             preferred_element_type=F32) * invn_ref[...]   # [N, D]
    mean_m = lax.dot_general(n_oh, xm.astype(BF16), (((0,), (0,)), ((), ())),
                             preferred_element_type=F32) * invn_ref[...]   # [N, D]

    r_oh = (rid_ref[...] == lax.broadcasted_iota(jnp.int32, (R, N), 1)).astype(BF16)
    root_x = jnp.dot(r_oh, mean_x.astype(BF16), preferred_element_type=F32)  # [R, D]
    root_m = jnp.dot(r_oh, mean_m.astype(BF16), preferred_element_type=F32)  # [R, D]

    h = (jnp.dot(root_x.astype(BF16), w1a_ref[...].astype(BF16),
                 preferred_element_type=F32)
         + jnp.dot(root_m.astype(BF16), w1b_ref[...].astype(BF16),
                   preferred_element_type=F32)
         + b1_ref[...])
    h = jax.nn.relu(h)                                    # BN identity
    out = jnp.dot(h.astype(BF16), w2_ref[...].astype(BF16),
                  preferred_element_type=F32) + b2_ref[...]
    o_ref[...] = out


def tail_forward(x, mix, bid, nid, rid, invn, w1a, w1b, b1, w2, b2):
    M, D = x.shape
    BP = mix.shape[0]
    N = invn.shape[0]
    R = rid.shape[0]
    DO = b1.shape[1]

    def c(shape):
        return pl.BlockSpec(shape, lambda i, _n=len(shape): (0,) * _n)

    return pl.pallas_call(
        _tail_kernel,
        out_shape=jax.ShapeDtypeStruct((R, DO), F32),
        grid=(1,),
        in_specs=[c((M, D)), c((BP, D)), c((M, 1)), c((M, 1)), c((R, 1)),
                  c((N, 1)), c((D, DO)), c((D, DO)), c((1, DO)),
                  c((DO, DO)), c((1, DO))],
        out_specs=c((R, DO)),
        compiler_params=pltpu.CompilerParams(dimension_semantics=("arbitrary",)),
    )(x, mix, bid, nid, rid, invn, w1a, w1b, b1, w2, b2)


# ---------------------------------------------------------------------------
# Parameters (deterministic synthetic init, zero-padded to 128 lanes).
# ---------------------------------------------------------------------------
def init_params(key, cfg):
    nh, p = cfg["nhid"], cfg["n_patches"]
    Lg, Lm = cfg["nlayer_gnn"], cfg["nlayer_mlpmixer"]
    nout = cfg["nout"]
    th, ch = max(1, p // 2), 4 * nh
    D, TH, CH, DO = _rup(nh), _rup(th), _rup(ch), _rup(nout)
    keys = iter(jax.random.split(key, 128))

    def w(shape, scale=0.1):
        return (scale * jax.random.normal(next(keys), shape)).astype(F32)

    def pad(a, shape):
        out = jnp.zeros(shape, F32)
        return out.at[tuple(slice(0, s) for s in a.shape)].set(a)

    prm = {}
    prm["key_emb"] = pad(w((cfg["nfeat_node"], nh)), (cfg["nfeat_node"], D))
    prm["val_emb"] = pad(w((cfg["nfeat_node"], nh)), (cfg["nfeat_node"], D))
    prm["edge_emb"] = pad(w((cfg["nfeat_edge"], nh)), (cfg["nfeat_edge"], D))

    prm["gnn_w"] = jnp.stack([pad(w((nh, nh)), (D, D)) for _ in range(Lg)]).astype(BF16)
    prm["gnn_b"] = jnp.zeros((Lg, 1, D), F32)
    uws = [jnp.zeros((D, D), F32)] + [pad(w((nh, nh)), (D, D)) for _ in range(Lg - 1)]
    prm["U_w"] = jnp.stack(uws).astype(BF16)              # slot 0 unused (layer 0)
    prm["U_b"] = jnp.zeros((Lg, 1, D), F32)

    ones_nh = pad(jnp.ones((1, nh), F32), (1, D))         # LN gamma: 0 on pad lanes
    prm["mix"] = dict(
        g1=jnp.stack([ones_nh] * Lm), b1=jnp.zeros((Lm, 1, D), F32),
        wt1=jnp.stack([pad(w((p, th)), (p, TH)) for _ in range(Lm)]).astype(BF16),
        bt1=jnp.zeros((Lm, 1, TH), F32),
        wt2=jnp.stack([pad(w((th, p)), (TH, p)) for _ in range(Lm)]),
        bt2=jnp.zeros((Lm, p, 1), F32),
        g2=jnp.stack([ones_nh] * Lm), b2=jnp.zeros((Lm, 1, D), F32),
        wc1=jnp.stack([pad(w((nh, ch)), (D, CH)) for _ in range(Lm)]).astype(BF16),
        bc1=jnp.zeros((Lm, 1, CH), F32),
        wc2=jnp.stack([pad(w((ch, nh)), (CH, D)) for _ in range(Lm)]).astype(BF16),
        bc2=jnp.zeros((Lm, 1, D), F32))

    dw1 = w((2 * nh, nout))
    prm["dec_w1a"] = pad(dw1[:nh], (D, DO)).astype(BF16)   # x half of concat
    prm["dec_w1b"] = pad(dw1[nh:], (D, DO)).astype(BF16)   # mixer half of concat
    prm["dec_b1"] = jnp.zeros((1, DO), F32)
    prm["dec_w2"] = pad(w((nout, nout)), (DO, DO)).astype(BF16)
    prm["dec_b2"] = jnp.zeros((1, DO), F32)
    return prm


# ---------------------------------------------------------------------------
# Forward pass (mirrors GraphMLPMixer4TreeNeighbour.forward)
# ---------------------------------------------------------------------------
def forward(params, data, cfg):
    B, p, nh = cfg["batch"], cfg["n_patches"], cfg["nhid"]
    BP = B * p
    N = data["x"].shape[0]
    D = params["key_emb"].shape[1]

    # FeatureEncoder embeddings (plain-JAX gathers; tables are lane-padded)
    x0 = params["key_emb"][data["x"][:, 0]] + params["val_emb"][data["x"][:, 1]]
    edge_attr = params["edge_emb"][data["edge_attr"]]

    nm = data["subgraphs_nodes_mapper"].astype(jnp.int32)
    em = data["subgraphs_edges_mapper"].astype(jnp.int32)
    src = data["combined_subgraphs"][0].astype(jnp.int32)
    dst = data["combined_subgraphs"][1].astype(jnp.int32)
    batch_x = data["subgraphs_batch"].astype(jnp.int32)

    x = x0[nm]                                            # [M, D]
    e = edge_attr[em]                                     # [E, D]
    M, E = x.shape[0], e.shape[0]

    # per-segment inverse counts (constant across layers) — computed once
    inv_bp = (1.0 / jnp.maximum(
        jnp.zeros((BP,), F32).at[batch_x].add(1.0), 1.0)).reshape(BP, 1)
    inv_n = (1.0 / jnp.maximum(
        jnp.zeros((N,), F32).at[nm].add(1.0), 1.0)).reshape(N, 1)

    x_final, subgraph_x = gnn_forward(
        x, e, src.reshape(E, 1), dst.reshape(E, 1),
        batch_x.reshape(M, 1), nm.reshape(M, 1), inv_bp, inv_n,
        params["gnn_w"], params["gnn_b"], params["U_w"], params["U_b"])

    mixer_x = subgraph_x.reshape(B, p, D)                 # '(B p) d -> B p d'
    mask_valid = data["mask"].astype(F32).reshape(B, p, 1)
    mixer_x = mixer_forward(mixer_x, mask_valid, params["mix"], nh)
    mixer_flat = mixer_x.reshape(BP, D)                   # 'B p d -> (B p) d'

    root_idx = data["root_index"].astype(jnp.int32).reshape(-1, 1)
    out = tail_forward(x_final, mixer_flat, batch_x.reshape(M, 1),
                       nm.reshape(M, 1), root_idx, inv_n,
                       params["dec_w1a"], params["dec_w1b"], params["dec_b1"],
                       params["dec_w2"], params["dec_b2"])
    return out[:, :cfg["nout"]]                           # strip lane padding


# ---------------------------------------------------------------------------
if __name__ == "__main__":
    cfg = dict(nfeat_node=5, nfeat_edge=4, nhid=32, nout=8,
               nlayer_gnn=2, nlayer_mlpmixer=2, n_patches=8, batch=2)

    key = jax.random.PRNGKey(0)
    pkey, dkey = jax.random.split(key)
    params = init_params(pkey, cfg)

    N, M, Ne, E = 20, 48, 30, 64
    B, p = cfg["batch"], cfg["n_patches"]
    ks = jax.random.split(dkey, 8)
    x_feat = jax.random.randint(ks[0], (N, 2), 0, cfg["nfeat_node"], dtype=jnp.int32)
    edge_attr = jax.random.randint(ks[1], (Ne,), 0, cfg["nfeat_edge"], dtype=jnp.int32)
    nodes_mapper = jax.random.randint(ks[2], (M,), 0, N, dtype=jnp.int32)
    edges_mapper = jax.random.randint(ks[3], (E,), 0, Ne, dtype=jnp.int32)
    combined = jax.random.randint(ks[4], (2, E), 0, M, dtype=jnp.int32)

    # last patch of every graph is padding (mask=False); subgraph ids avoid it
    mask = jnp.ones((B, p), dtype=bool).at[:, -1].set(False)
    valid_ids = jnp.nonzero(mask.reshape(-1))[0].astype(jnp.int32)
    sel = jax.random.randint(ks[5], (M,), 0, valid_ids.shape[0], dtype=jnp.int32)
    batch_x = valid_ids[sel]

    data = dict(x=x_feat,
                edge_attr=edge_attr,
                subgraphs_nodes_mapper=nodes_mapper,
                subgraphs_edges_mapper=edges_mapper,
                combined_subgraphs=combined,
                subgraphs_batch=batch_x,
                mask=mask,
                root_index=jnp.array([0, N // 2], dtype=jnp.int32))

    out = forward(params, data, cfg)
    out = jax.block_until_ready(out)
    assert out.shape == (2, cfg["nout"]), out.shape
    assert bool(jnp.all(jnp.isfinite(out)))
    print("KERNEL_OK")
</pallas_src>

<mosaic_0001>
module attributes {stable_mosaic.version = 11 : i64} {
  func.func @_gnn_kernel(%arg0: i32, %arg1: memref<48x128xf32, #tpu.memory_space<vmem>>, %arg2: memref<64x128xf32, #tpu.memory_space<vmem>>, %arg3: memref<64x1xi32, #tpu.memory_space<vmem>>, %arg4: memref<64x1xi32, #tpu.memory_space<vmem>>, %arg5: memref<48x1xi32, #tpu.memory_space<vmem>>, %arg6: memref<48x1xi32, #tpu.memory_space<vmem>>, %arg7: memref<16x1xf32, #tpu.memory_space<vmem>>, %arg8: memref<20x1xf32, #tpu.memory_space<vmem>>, %arg9: memref<1x128x128xbf16, #tpu.memory_space<vmem>>, %arg10: memref<1x1x128xf32, #tpu.memory_space<vmem>>, %arg11: memref<1x128x128xbf16, #tpu.memory_space<vmem>>, %arg12: memref<1x1x128xf32, #tpu.memory_space<vmem>>, %arg13: memref<48x128xf32, #tpu.memory_space<vmem>>, %arg14: memref<16x128xf32, #tpu.memory_space<vmem>>) attributes {dimension_semantics = [#tpu.dimension_semantics<arbitrary>], iteration_bounds = array<i64: 2>, scalar_prefetch = 0 : i64, scratch_operands = 0 : i64, tpu.core_type = #tpu.core_type<tc>, window_params = [{pipeline_mode = #tpu.pipeline_mode<synchronous>, transform_indices = @transform_0, window_bounds = array<i64: 48, 128>}, {pipeline_mode = #tpu.pipeline_mode<synchronous>, transform_indices = @transform_1, window_bounds = array<i64: 64, 128>}, {pipeline_mode = #tpu.pipeline_mode<synchronous>, transform_indices = @transform_2, window_bounds = array<i64: 64, 1>}, {pipeline_mode = #tpu.pipeline_mode<synchronous>, transform_indices = @transform_3, window_bounds = array<i64: 64, 1>}, {pipeline_mode = #tpu.pipeline_mode<synchronous>, transform_indices = @transform_4, window_bounds = array<i64: 48, 1>}, {pipeline_mode = #tpu.pipeline_mode<synchronous>, transform_indices = @transform_5, window_bounds = array<i64: 48, 1>}, {pipeline_mode = #tpu.pipeline_mode<synchronous>, transform_indices = @transform_6, window_bounds = array<i64: 16, 1>}, {pipeline_mode = #tpu.pipeline_mode<synchronous>, transform_indices = @transform_7, window_bounds = array<i64: 20, 1>}, {transform_indices = @transform_8, window_bounds = array<i64: 1, 128, 128>}, {transform_indices = @transform_9, window_bounds = array<i64: 1, 1, 128>}, {transform_indices = @transform_10, window_bounds = array<i64: 1, 128, 128>}, {transform_indices = @transform_11, window_bounds = array<i64: 1, 1, 128>}, {pipeline_mode = #tpu.pipeline_mode<synchronous>, transform_indices = @transform_12, window_bounds = array<i64: 48, 128>}, {pipeline_mode = #tpu.pipeline_mode<synchronous>, transform_indices = @transform_13, window_bounds = array<i64: 16, 128>}]} {
    %c0 = arith.constant 0 : index
    %c0_0 = arith.constant 0 : index
    %0 = vector.load %arg5[%c0, %c0_0] : memref<48x1xi32, #tpu.memory_space<vmem>>, vector<48x1xi32>
    %c0_1 = arith.constant 0 : index
    %c0_2 = arith.constant 0 : index
    %1 = vector.load %arg6[%c0_1, %c0_2] : memref<48x1xi32, #tpu.memory_space<vmem>>, vector<48x1xi32>
    %c0_i32 = arith.constant 0 : i32
    %2 = arith.cmpi eq, %arg0, %c0_i32 : i32
    %3 = arith.extui %2 : i1 to i32
    %c0_i32_3 = arith.constant 0 : i32
    %4 = arith.cmpi ne, %3, %c0_i32_3 : i32
    scf.if %4 {
      %c0_28 = arith.constant 0 : index
      %c0_29 = arith.constant 0 : index
      %49 = vector.load %arg1[%c0_28, %c0_29] : memref<48x128xf32, #tpu.memory_space<vmem>>, vector<48x128xf32>
      %c0_30 = arith.constant 0 : index
      %c0_31 = arith.constant 0 : index
      %50 = vector.load %arg13[%c0_30, %c0_31] : memref<48x128xf32, #tpu.memory_space<vmem>>, vector<48x128xf32>
      tpu.vector_store %arg13[%c0_30, %c0_31], %49 {strides = array<i32>} : memref<48x128xf32, #tpu.memory_space<vmem>>, vector<48x128xf32>,
    } else {
    }
    %c0_i32_4 = arith.constant 0 : i32
    %5 = arith.cmpi sgt, %arg0, %c0_i32_4 : i32
    %6 = arith.extui %5 : i1 to i32
    %c0_i32_5 = arith.constant 0 : i32
    %7 = arith.cmpi ne, %6, %c0_i32_5 : i32
    scf.if %7 {
      %c0_28 = arith.constant 0 : index
      %c0_29 = arith.constant 0 : index
      %49 = vector.load %arg13[%c0_28, %c0_29] : memref<48x128xf32, #tpu.memory_space<vmem>>, vector<48x128xf32>
      %50 = tpu.iota {dimensions = array<i32: 1>} : vector<48x16xi32>
      %51 = vector.broadcast %0 : vector<48x1xi32> to vector<48x16xi32>
      %52 = arith.cmpi eq, %51, %50 : vector<48x16xi32>
      %53 = arith.extui %52 : vector<48x16xi1> to vector<48x16xi32>
      %54 = arith.sitofp %53 : vector<48x16xi32> to vector<48x16xf32>
      %55 = arith.truncf %54 : vector<48x16xf32> to vector<48x16xbf16>
      %56 = arith.truncf %49 : vector<48x128xf32> to vector<48x128xbf16>
      %cst_30 = arith.constant dense<0.000000e+00> : vector<16x128xf32>
      %57 = tpu.matmul %55, %56, %cst_30 {dimension_numbers = #tpu.dot_dimension_numbers<[0], [0], [1], [1], [0, 1, 1, 1], [], []>} : vector<48x16xbf16>, vector<48x128xbf16>, vector<16x128xf32> -> vector<16x128xf32>
      %c0_31 = arith.constant 0 : index
      %c0_32 = arith.constant 0 : index
      %58 = vector.load %arg7[%c0_31, %c0_32] : memref<16x1xf32, #tpu.memory_space<vmem>>, vector<16x1xf32>
      %59 = vector.broadcast %58 : vector<16x1xf32> to vector<16x128xf32>
      %60 = arith.mulf %57, %59 : vector<16x128xf32>
      %61 = arith.truncf %60 : vector<16x128xf32> to vector<16x128xbf16>
      %cst_33 = arith.constant dense<0.000000e+00> : vector<48x128xf32>
      %62 = tpu.matmul %55, %61, %cst_33 {dimension_numbers = #tpu.dot_dimension_numbers<[1], [0], [0], [1], [0, 0, 1, 1], [], []>} : vector<48x16xbf16>, vector<16x128xbf16>, vector<48x128xf32> -> vector<48x128xf32>
      %63 = arith.truncf %62 : vector<48x128xf32> to vector<48x128xbf16>
      %c0_34 = arith.constant 0 : index
      %c0_35 = arith.constant 0 : index
      %c0_36 = arith.constant 0 : index
      %64 = vector.load %arg11[%c0_34, %c0_35, %c0_36] : memref<1x128x128xbf16, #tpu.memory_space<vmem>>, vector<1x128x128xbf16>
      %65 = vector.shape_cast %64 : vector<1x128x128xbf16> to vector<128x128xbf16>
      %cst_37 = arith.constant dense<0.000000e+00> : vector<48x128xf32>
      %66 = tpu.matmul %63, %65, %cst_37 {dimension_numbers = #tpu.dot_dimension_numbers<[1], [0], [0], [1], [0, 0, 1, 1], [], []>} : vector<48x128xbf16>, vector<128x128xbf16>, vector<48x128xf32> -> vector<48x128xf32>
      %c0_38 = arith.constant 0 : index
      %c0_39 = arith.constant 0 : index
      %c0_40 = arith.constant 0 : index
      %67 = vector.load %arg12[%c0_38, %c0_39, %c0_40] : memref<1x1x128xf32, #tpu.memory_space<vmem>>, vector<1x1x128xf32>
      %68 = vector.shape_cast %67 : vector<1x1x128xf32> to vector<1x128xf32>
      %69 = vector.broadcast %68 : vector<1x128xf32> to vector<48x128xf32>
      %70 = arith.addf %66, %69 : vector<48x128xf32>
      %cst_41 = arith.constant 0.000000e+00 : f32
      %71 = vector.broadcast %cst_41 : f32 to vector<48x128xf32>
      %72 = arith.maximumf %70, %71 : vector<48x128xf32>
      %73 = arith.addf %49, %72 : vector<48x128xf32>
      %74 = tpu.iota {dimensions = array<i32: 1>} : vector<48x20xi32>
      %75 = vector.broadcast %1 : vector<48x1xi32> to vector<48x20xi32>
      %76 = arith.cmpi eq, %75, %74 : vector<48x20xi32>
      %77 = arith.extui %76 : vector<48x20xi1> to vector<48x20xi32>
      %78 = arith.sitofp %77 : vector<48x20xi32> to vector<48x20xf32>
      %79 = arith.truncf %78 : vector<48x20xf32> to vector<48x20xbf16>
      %80 = arith.truncf %73 : vector<48x128xf32> to vector<48x128xbf16>
      %cst_42 = arith.constant dense<0.000000e+00> : vector<20x128xf32>
      %81 = tpu.matmul %79, %80, %cst_42 {dimension_numbers = #tpu.dot_dimension_numbers<[0], [0], [1], [1], [0, 1, 1, 1], [], []>} : vector<48x20xbf16>, vector<48x128xbf16>, vector<20x128xf32> -> vector<20x128xf32>
      %c0_43 = arith.constant 0 : index
      %c0_44 = arith.constant 0 : index
      %82 = vector.load %arg8[%c0_43, %c0_44] : memref<20x1xf32, #tpu.memory_space<vmem>>, vector<20x1xf32>
      %83 = vector.broadcast %82 : vector<20x1xf32> to vector<20x128xf32>
      %84 = arith.mulf %81, %83 : vector<20x128xf32>
      %85 = arith.truncf %84 : vector<20x128xf32> to vector<20x128xbf16>
      %cst_45 = arith.constant dense<0.000000e+00> : vector<48x128xf32>
      %86 = tpu.matmul %79, %85, %cst_45 {dimension_numbers = #tpu.dot_dimension_numbers<[1], [0], [0], [1], [0, 0, 1, 1], [], []>} : vector<48x20xbf16>, vector<20x128xbf16>, vector<48x128xf32> -> vector<48x128xf32>
      %c0_46 = arith.constant 0 : index
      %c0_47 = arith.constant 0 : index
      %87 = vector.load %arg13[%c0_46, %c0_47] : memref<48x128xf32, #tpu.memory_space<vmem>>, vector<48x128xf32>
      tpu.vector_store %arg13[%c0_46, %c0_47], %86 {strides = array<i32>} : memref<48x128xf32, #tpu.memory_space<vmem>>, vector<48x128xf32>,
    } else {
    }
    %c0_6 = arith.constant 0 : index
    %c0_7 = arith.constant 0 : index
    %8 = vector.load %arg13[%c0_6, %c0_7] : memref<48x128xf32, #tpu.memory_space<vmem>>, vector<48x128xf32>
    %c0_8 = arith.constant 0 : index
    %c0_9 = arith.constant 0 : index
    %9 = vector.load %arg3[%c0_8, %c0_9] : memref<64x1xi32, #tpu.memory_space<vmem>>, vector<64x1xi32>
    %10 = tpu.iota {dimensions = array<i32: 1>} : vector<64x48xi32>
    %11 = vector.broadcast %9 : vector<64x1xi32> to vector<64x48xi32>
    %12 = arith.cmpi eq, %11, %10 : vector<64x48xi32>
    %13 = arith.extui %12 : vector<64x48xi1> to vector<64x48xi32>
    %14 = arith.sitofp %13 : vector<64x48xi32> to vector<64x48xf32>
    %15 = arith.truncf %14 : vector<64x48xf32> to vector<64x48xbf16>
    %c0_10 = arith.constant 0 : index
    %c0_11 = arith.constant 0 : index
    %16 = vector.load %arg4[%c0_10, %c0_11] : memref<64x1xi32, #tpu.memory_space<vmem>>, vector<64x1xi32>
    %17 = tpu.iota {dimensions = array<i32: 1>} : vector<64x48xi32>
    %18 = vector.broadcast %16 : vector<64x1xi32> to vector<64x48xi32>
    %19 = arith.cmpi eq, %18, %17 : vector<64x48xi32>
    %20 = arith.extui %19 : vector<64x48xi1> to vector<64x48xi32>
    %21 = arith.sitofp %20 : vector<64x48xi32> to vector<64x48xf32>
    %22 = arith.truncf %21 : vector<64x48xf32> to vector<64x48xbf16>
    %23 = arith.truncf %8 : vector<48x128xf32> to vector<48x128xbf16>
    %cst = arith.constant dense<0.000000e+00> : vector<64x128xf32>
    %24 = tpu.matmul %15, %23, %cst {dimension_numbers = #tpu.dot_dimension_numbers<[1], [0], [0], [1], [0, 0, 1, 1], [], []>} : vector<64x48xbf16>, vector<48x128xbf16>, vector<64x128xf32> -> vector<64x128xf32>
    %c0_12 = arith.constant 0 : index
    %c0_13 = arith.constant 0 : index
    %25 = vector.load %arg2[%c0_12, %c0_13] : memref<64x128xf32, #tpu.memory_space<vmem>>, vector<64x128xf32>
    %26 = arith.addf %24, %25 : vector<64x128xf32>
    %cst_14 = arith.constant 0.000000e+00 : f32
    %27 = vector.broadcast %cst_14 : f32 to vector<64x128xf32>
    %28 = arith.maximumf %26, %27 : vector<64x128xf32>
    %29 = arith.truncf %28 : vector<64x128xf32> to vector<64x128xbf16>
    %cst_15 = arith.constant dense<0.000000e+00> : vector<48x128xf32>
    %30 = tpu.matmul %22, %29, %cst_15 {dimension_numbers = #tpu.dot_dimension_numbers<[0], [0], [1], [1], [0, 1, 1, 1], [], []>} : vector<64x48xbf16>, vector<64x128xbf16>, vector<48x128xf32> -> vector<48x128xf32>
    %cst_16 = arith.constant 1.000000e+00 : f32
    %31 = vector.broadcast %cst_16 : f32 to vector<48x128xf32>
    %32 = arith.mulf %31, %8 : vector<48x128xf32>
    %33 = arith.addf %32, %30 : vector<48x128xf32>
    %34 = arith.truncf %33 : vector<48x128xf32> to vector<48x128xbf16>
    %c0_17 = arith.constant 0 : index
    %c0_18 = arith.constant 0 : index
    %c0_19 = arith.constant 0 : index
    %35 = vector.load %arg9[%c0_17, %c0_18, %c0_19] : memref<1x128x128xbf16, #tpu.memory_space<vmem>>, vector<1x128x128xbf16>
    %36 = vector.shape_cast %35 : vector<1x128x128xbf16> to vector<128x128xbf16>
    %cst_20 = arith.constant dense<0.000000e+00> : vector<48x128xf32>
    %37 = tpu.matmul %34, %36, %cst_20 {dimension_numbers = #tpu.dot_dimension_numbers<[1], [0], [0], [1], [0, 0, 1, 1], [], []>} : vector<48x128xbf16>, vector<128x128xbf16>, vector<48x128xf32> -> vector<48x128xf32>
    %c0_21 = arith.constant 0 : index
    %c0_22 = arith.constant 0 : index
    %c0_23 = arith.constant 0 : index
    %38 = vector.load %arg10[%c0_21, %c0_22, %c0_23] : memref<1x1x128xf32, #tpu.memory_space<vmem>>, vector<1x1x128xf32>
    %39 = vector.shape_cast %38 : vector<1x1x128xf32> to vector<1x128xf32>
    %40 = vector.broadcast %39 : vector<1x128xf32> to vector<48x128xf32>
    %41 = arith.addf %37, %40 : vector<48x128xf32>
    %cst_24 = arith.constant 0.000000e+00 : f32
    %42 = vector.broadcast %cst_24 : f32 to vector<48x128xf32>
    %43 = arith.maximumf %41, %42 : vector<48x128xf32>
    %44 = arith.addf %43, %8 : vector<48x128xf32>
    %c0_25 = arith.constant 0 : index
    %c0_26 = arith.constant 0 : index
    %45 = vector.load %arg13[%c0_25, %c0_26] : memref<48x128xf32, #tpu.memory_space<vmem>>, vector<48x128xf32>
    tpu.vector_store %arg13[%c0_25, %c0_26], %44 {strides = array<i32>} : memref<48x128xf32, #tpu.memory_space<vmem>>, vector<48x128xf32>,
    %c1_i32 = arith.constant 1 : i32
    %46 = arith.cmpi eq, %arg0, %c1_i32 : i32
    %47 = arith.extui %46 : i1 to i32
    %c0_i32_27 = arith.constant 0 : i32
    %48 = arith.cmpi ne, %47, %c0_i32_27 : i32
    scf.if %48 {
      %c0_28 = arith.constant 0 : index
      %c0_29 = arith.constant 0 : index
      %49 = vector.load %arg13[%c0_28, %c0_29] : memref<48x128xf32, #tpu.memory_space<vmem>>, vector<48x128xf32>
      %50 = tpu.iota {dimensions = array<i32: 1>} : vector<48x16xi32>
      %51 = vector.broadcast %0 : vector<48x1xi32> to vector<48x16xi32>
      %52 = arith.cmpi eq, %51, %50 : vector<48x16xi32>
      %53 = arith.extui %52 : vector<48x16xi1> to vector<48x16xi32>
      %54 = arith.sitofp %53 : vector<48x16xi32> to vector<48x16xf32>
      %55 = arith.truncf %54 : vector<48x16xf32> to vector<48x16xbf16>
      %56 = arith.truncf %49 : vector<48x128xf32> to vector<48x128xbf16>
      %cst_30 = arith.constant dense<0.000000e+00> : vector<16x128xf32>
      %57 = tpu.matmul %55, %56, %cst_30 {dimension_numbers = #tpu.dot_dimension_numbers<[0], [0], [1], [1], [0, 1, 1, 1], [], []>} : vector<48x16xbf16>, vector<48x128xbf16>, vector<16x128xf32> -> vector<16x128xf32>
      %c0_31 = arith.constant 0 : index
      %c0_32 = arith.constant 0 : index
      %58 = vector.load %arg7[%c0_31, %c0_32] : memref<16x1xf32, #tpu.memory_space<vmem>>, vector<16x1xf32>
      %59 = vector.broadcast %58 : vector<16x1xf32> to vector<16x128xf32>
      %60 = arith.mulf %57, %59 : vector<16x128xf32>
      %c0_33 = arith.constant 0 : index
      %c0_34 = arith.constant 0 : index
      %61 = vector.load %arg14[%c0_33, %c0_34] : memref<16x128xf32, #tpu.memory_space<vmem>>, vector<16x128xf32>
      tpu.vector_store %arg14[%c0_33, %c0_34], %60 {strides = array<i32>} : memref<16x128xf32, #tpu.memory_space<vmem>>, vector<16x128xf32>,
    } else {
    }
    return
  }
  func.func @transform_0(%arg0: i32) -> (i32, i32) {
    %c0_i32 = arith.constant 0 : i32
    %c0_i32_0 = arith.constant 0 : i32
    %c0_i32_1 = arith.constant 0 : i32
    return %c0_i32, %c0_i32_0 : i32, i32
  }
  func.func @transform_1(%arg0: i32) -> (i32, i32) {
    %c0_i32 = arith.constant 0 : i32
    %c0_i32_0 = arith.constant 0 : i32
    %c0_i32_1 = arith.constant 0 : i32
    return %c0_i32, %c0_i32_0 : i32, i32
  }
  func.func @transform_2(%arg0: i32) -> (i32, i32) {
    %c0_i32 = arith.constant 0 : i32
    %c0_i32_0 = arith.constant 0 : i32
    %c0_i32_1 = arith.constant 0 : i32
    return %c0_i32, %c0_i32_0 : i32, i32
  }
  func.func @transform_3(%arg0: i32) -> (i32, i32) {
    %c0_i32 = arith.constant 0 : i32
    %c0_i32_0 = arith.constant 0 : i32
    %c0_i32_1 = arith.constant 0 : i32
    return %c0_i32, %c0_i32_0 : i32, i32
  }
  func.func @transform_4(%arg0: i32) -> (i32, i32) {
    %c0_i32 = arith.constant 0 : i32
    %c0_i32_0 = arith.constant 0 : i32
    %c0_i32_1 = arith.constant 0 : i32
    return %c0_i32, %c0_i32_0 : i32, i32
  }
  func.func @transform_5(%arg0: i32) -> (i32, i32) {
    %c0_i32 = arith.constant 0 : i32
    %c0_i32_0 = arith.constant 0 : i32
    %c0_i32_1 = arith.constant 0 : i32
    return %c0_i32, %c0_i32_0 : i32, i32
  }
  func.func @transform_6(%arg0: i32) -> (i32, i32) {
    %c0_i32 = arith.constant 0 : i32
    %c0_i32_0 = arith.constant 0 : i32
    %c0_i32_1 = arith.constant 0 : i32
    return %c0_i32, %c0_i32_0 : i32, i32
  }
  func.func @transform_7(%arg0: i32) -> (i32, i32) {
    %c0_i32 = arith.constant 0 : i32
    %c0_i32_0 = arith.constant 0 : i32
    %c0_i32_1 = arith.constant 0 : i32
    return %c0_i32, %c0_i32_0 : i32, i32
  }
  func.func @transform_8(%arg0: i32) -> (i32, i32, i32) {
    %c0_i32 = arith.constant 0 : i32
    %c0_i32_0 = arith.constant 0 : i32
    %c0_i32_1 = arith.constant 0 : i32
    return %arg0, %c0_i32, %c0_i32_0 : i32, i32, i32
  }
  func.func @transform_9(%arg0: i32) -> (i32, i32, i32) {
    %c0_i32 = arith.constant 0 : i32
    %c0_i32_0 = arith.constant 0 : i32
    %c0_i32_1 = arith.constant 0 : i32
    return %arg0, %c0_i32, %c0_i32_0 : i32, i32, i32
  }
  func.func @transform_10(%arg0: i32) -> (i32, i32, i32) {
    %c0_i32 = arith.constant 0 : i32
    %c0_i32_0 = arith.constant 0 : i32
    %c0_i32_1 = arith.constant 0 : i32
    return %arg0, %c0_i32, %c0_i32_0 : i32, i32, i32
  }
  func.func @transform_11(%arg0: i32) -> (i32, i32, i32) {
    %c0_i32 = arith.constant 0 : i32
    %c0_i32_0 = arith.constant 0 : i32
    %c0_i32_1 = arith.constant 0 : i32
    return %arg0, %c0_i32, %c0_i32_0 : i32, i32, i32
  }
  func.func @transform_12(%arg0: i32) -> (i32, i32) {
    %c0_i32 = arith.constant 0 : i32
    %c0_i32_0 = arith.constant 0 : i32
    %c0_i32_1 = arith.constant 0 : i32
    return %c0_i32, %c0_i32_0 : i32, i32
  }
  func.func @transform_13(%arg0: i32) -> (i32, i32) {
    %c0_i32 = arith.constant 0 : i32
    %c0_i32_0 = arith.constant 0 : i32
    %c0_i32_1 = arith.constant 0 : i32
    return %c0_i32, %c0_i32_0 : i32, i32
  }
}

</mosaic_0001>

<bundles_post_ra>
// kernel: tpu_custom_call.1
= control target key start
LH: loop header
LB: loop body
LE: loop exit
PB: predicated region body
PF: predicated region fallthrough
CT: control target
= control target key end

     0   :  { %s2844_s0 = inlined_call_operand.hbm [shape: f32[48,128], index: 0, kind: input, shape index: {}]   ;;  %s2845_s1 = inlined_call_operand.hbm [shape: f32[64,128], index: 1, kind: input, shape index: {}]   ;;  %s2846_s2 = inlined_call_operand.vmem [shape: s32[64,1], index: 2, kind: input, shape index: {}]   ;;  %s2847_s3 = inlined_call_operand.vmem [shape: s32[64,1], index: 3, kind: input, shape index: {}]   ;;  %s2848_s4 = inlined_call_operand.vmem [shape: s32[48,1], index: 4, kind: input, shape index: {}]   ;;  %s2849_s5 = inlined_call_operand.vmem [shape: s32[48,1], index: 5, kind: input, shape index: {}]   ;;  %s2850_s6 = inlined_call_operand.vmem [shape: f32[16,1], index: 6, kind: input, shape index: {}]   ;;  %s2851_s7 = inlined_call_operand.vmem [shape: f32[20,1], index: 7, kind: input, shape index: {}]   ;;  %s2852_s8 = inlined_call_operand.vmem [shape: bf16[2,128,128], index: 8, kind: input, shape index: {}]   ;;  %s2853_s9 = inlined_call_operand.vmem [shape: f32[2,1,128], index: 9, kind: input, shape index: {}]   ;;  %s2854_s10 = inlined_call_operand.vmem [shape: bf16[2,128,128], index: 10, kind: input, shape index: {}]   ;;  %s2855_s11 = inlined_call_operand.vmem [shape: f32[2,1,128], index: 11, kind: input, shape index: {}]   ;;  %s2856_s12 = inlined_call_operand.hbm [shape: f32[48,128], index: 12, kind: output, shape index: {0}]   ;;  %s2857_s13 = inlined_call_operand.hbm [shape: f32[16,128], index: 13, kind: output, shape index: {1}]  }
   0x1   :  { %2858 = sst [smem:[#allocation14_spill]] %s2844_s0 }
   0x2   :  { %19 = vsyncpa [#allocation3], 0 }
   0x3   :  { %20 = vsyncpa [#allocation6], 0 }
   0x4   :  { %21 = vsyncpa [#allocation4], 0 }
   0x5   :  { %22 = vsyncpa [#allocation9], 0  ;;  %s2393_s25 = smov 0  }
   0x6 LB: > { %s2399_s26 = sadd.s32 4294967295, %s2304_s25   ;;  %p1805_p0 = scmp.ge.s32.totalorder %s2304_s25, 1  ;;  %s2304_s25 = sphi %s2393_s25, %s28_s25  }
   0x7   : > { %p347_p1 = scmp.lt.s32.totalorder %s2304_s25, 3  ;;  %s2306_s27 = smov [#allocation2]  }
   0x8   : > { %s359_s28 = sshll.u32 %s2306_s27, 4  ;;  %p2127_p4 = scmp.eq.s32.totalorder %s2399_s26, 0  ;;  %s360_s28 = int_to_ptr.vmem [resolvable:$true] %s359_s28 }
   0x9   : > { %p2404_p3 = pnand %p1805_p0, %p347_p1  ;;  %s2307_s30 = smov [#allocation5]  }
   0xa   : > { %s372_s14 = sshll.u32 %s2307_s30, 4  ;;  %s2193_s16 = scalar_lea.vmem %s360_s28, 768  ;;  %s373_s14 = int_to_ptr.vmem [resolvable:$true] %s372_s14 }
   0xb   : > { %p2120_p5 = pneg %p2404_p3  ;;  %p2194_p8 = scmp.ne.s32.totalorder %s360_s28, %s2193_s16 }
   0xc   : > { %p2201_p11 = scmp.lt.s32.totalorder %s360_s28, %s360_s28  ;;  %p2202_p12 = scmp.lt.s32.totalorder %s2193_s16, %s2193_s16 }
   0xd   : > { %p2413_p6 = pnand %p2127_p4, %p2120_p5 }
   0xe   : > { %p2203_p13 = por %p2202_p12, %p2201_p11 }
   0xf   : > { %p2184_p7 = pneg %p2413_p6 }
  0x11   : > { %p2196_p9 = pnand %p2194_p8, %p2184_p7 }
  0x13   : > { %p2197_p10 = pneg %p2196_p9 }
  0x15   : > { %p2204_p0 = pnand %p2203_p13, %p2197_p10 }
  0x17   : > { %2207 = shalt.err (!%p2204_p0)
}
  0x18   : > { %s2308_s17 = smov 128   ;;  %s2309_s18 = smov 8  }
  0x19   : > { %s2861_s0 = sld [smem:[#allocation14_spill]]  ;;  %s2219_s21 = scalar_lea.vmem %s373_s14, 1024 }
  0x1a   : > { %p2220_p1 = scmp.ne.s32.totalorder %s373_s14, %s2219_s21  ;;  %p2227_p9 = scmp.lt.s32.totalorder %s373_s14, %s373_s14 }
  0x1b   : > { %p2228_p2 = scmp.lt.s32.totalorder %s2219_s21, %s2219_s21 }
  0x1c   : > { %p2222_p5 = pnand %p2220_p1, %p2184_p7 }
  0x1d   : > { %p2229_p11 = por %p2228_p2, %p2227_p9 }
  0x1e   : > { %p2223_p8 = pneg %p2222_p5 }
  0x1f   : > { %2123 = dma.hbm_to_vmem [thread:$0]  (!%p2413_p6), %s2861_s0, 768, %s360_s28, [#allocation3], %s2308_s17, %s2308_s17, %s2309_s18  }
  0x20   : > { %p2230_p10 = pnand %p2229_p11, %p2223_p8 }
  0x22   : > { %2233 = shalt.err (!%p2230_p10)
}
  0x23   : > { %2126 = dma.hbm_to_vmem [thread:$0]  (!%p2413_p6), %s2845_s1, 1024, %s373_s14, [#allocation6], %s2308_s17, %s2308_s17, %s2309_s18  }
  0x24   : > { %434 = sbr.rel (%p2404_p3) target bundleno = 2599 (0xa27), region = 68 }
  0x29   : > { %2287 = dma.done.wait (%p2127_p4), [#allocation3], 768  }
  0x2a   : > { %2289 = vsyncadd (%p2127_p4), [#allocation3], 4294966528 }
  0x2b   : > { %2291 = dma.done.wait (%p2127_p4), [#allocation6], 1024  }
  0x2c   : > { %2293 = vsyncadd (%p2127_p4), [#allocation6], 4294966272  ;;  %p488_p2 = scmp.lt.s32.totalorder %s2399_s26, 1  ;;  %v2471_v0 = vld [vmem:[%s2848_s4] sm:$0xff]  ;;  %v2476_v1 = vld [vmem:[%s2848_s4 + $0x8] sm:$0xff]  ;;  %p2862_p3 = scmp.ne.s32.totalorder %s2399_s26, 0 }
  0x2d   : > { %v2481_v2 = vld [vmem:[%s2848_s4 + $0x10] sm:$0xff]  ;;  %v2486_v3 = vld [vmem:[%s2848_s4 + $0x18] sm:$0xff]  ;;  %v2491_v4 = vld [vmem:[%s2848_s4 + $0x20] sm:$0xff] }
  0x2e   : > { %s2447_s24 = scalar_select %p488_p2, %s2399_s26, 1  ;;  %v2496_v5 = vld [vmem:[%s2848_s4 + $0x28] sm:$0xff]  ;;  %v511_v6 = vld [vmem:[%s2849_s5] sm:$0xff]  ;;  %v513_v8 = vld [vmem:[%s2849_s5 + $0x10] sm:$0xff] }
  0x2f   : > { %v512_v7 = vld [vmem:[%s2849_s5 + $0x8] sm:$0xff]  ;;  %v514_v9 = vld [vmem:[%s2849_s5 + $0x18] sm:$0xff]  ;;  %v515_v10 = vld [vmem:[%s2849_s5 + $0x20] sm:$0xff]  ;;  %520 = sbr.rel (%p2862_p3) target bundleno = 56 (0x38), region = 80 }
  0x30   : > { %s1894_s27 = sshll.u32 %s2447_s24, 6  ;;  %s503_s22 = scalar_lea.vmem %s2855_s11, %s2447_s24  ;;  %v516_v11 = vld [vmem:[%s2849_s5 + $0x28] sm:$0xff] }
  0x31   : > { %s2457_s16 = scalar_lea.vmem %s2852_s8, %s1894_s27  ;;  %s2462_s19 = scalar_lea.vmem %s2854_s10, %s1894_s27 }
  0x34   : > { %v521_v12 = vld [vmem:[#allocation2] sm:$0xff]  ;;  %v522_v13 = vld [vmem:[#allocation2 + $0x8] sm:$0xff]  ;;  %v523_v14 = vld [vmem:[#allocation2 + $0x10] sm:$0xff] }
  0x35   : > { %527 = vst [vmem:[#allocation7] sm:$0xff] %v521_v12  ;;  %528 = vst [vmem:[#allocation7 + $0x8] sm:$0xff] %v522_v13  ;;  %v524_v15 = vld [vmem:[#allocation2 + $0x18] sm:$0xff]  ;;  %v525_v16 = vld [vmem:[#allocation2 + $0x20] sm:$0xff] }
  0x36   : > { %529 = vst [vmem:[#allocation7 + $0x10] sm:$0xff] %v523_v14  ;;  %v526_v17 = vld [vmem:[#allocation2 + $0x28] sm:$0xff]  ;;  %530 = vst [vmem:[#allocation7 + $0x18] sm:$0xff] %v524_v15 }
  0x37   : > { %531 = vst [vmem:[#allocation7 + $0x20] sm:$0xff] %v525_v16  ;;  %532 = vst [vmem:[#allocation7 + $0x28] sm:$0xff] %v526_v17 }
  0x38 PF: > { %p1817_p4 = scmp.le.s32.totalorder %s2399_s26, 0 }
  0x3a   : > { %536 = sbr.rel (%p1817_p4) target bundleno = 1353 (0x549), region = 84 }
  0x3f   : > { %v2310_v18 = vmov 0   ;;  %v2311_v19 = vmov 0.0   ;;  %v648_v20 = vld [vmem:[%s2850_s6] sm:$0xff]  ;;  %v649_v21 = vld [vmem:[%s2850_s6 + $0x8] sm:$0xff]  ;;  %v2533_v22 = vld [vmem:[#allocation7 + $0x20] sm:$0xff]  ;;  %vm2312_vm0 = vmmov 0   ;;  %v543_v31 = vlaneseq }
  0x40   : > { %2161 = vset.pattern.permute.xlu1 %v2310_v18  ;;  %2160 = vset.pattern.permute.xlu0 %v2310_v18  ;;  %v2535_v23 = vld [vmem:[#allocation7 + $0x28] sm:$0xff]  ;;  %v2537_v24 = vld [vmem:[#allocation7 + $0x10] sm:$0xff]  ;;  %v2541_v26 = vld [vmem:[#allocation7 + $0x18] sm:$0xff]  ;;  %vm603_vm13 = vcmask 392192   ;;  %vm663_vm14 = vcmask 130048   ;;  %vm1018_vm15 = vcmask 1041408  }
  0x41   : > { %552 = vperm.xlu1 %2161, %v2481_v2   ;;  %546 = vperm.xlu0 %2160, %v2471_v0   ;;  %v586_v25 = vpack.c.bf16 %v2535_v23, %v2533_v22  ;;  %v585_v27 = vpack.c.bf16 %v2541_v26, %v2537_v24  ;;  %v2550_v28 = vld [vmem:[#allocation7] sm:$0xff]  ;;  %v2552_v29 = vld [vmem:[#allocation7 + $0x8] sm:$0xff]  ;;  %v544_v32 = vand.u32 127, %v543_v31  ;;  %v985_v56 = vld [vmem:[%s2851_s7] sm:$0xff] }
  0x42   : > { %1954 = vmatprep.subr.bf16.mxu0 %v2311_v19  ;;  %1964 = vmatprep.subr.bf16.mxu1 %v2311_v19  ;;  %v584_v30 = vpack.c.bf16 %v2552_v29, %v2550_v28  ;;  %v987_v51 = vld [vmem:[%s2851_s7 + $0x10] sm:$0xf]  ;;  %v986_v58 = vld [vmem:[%s2851_s7 + $0x8] sm:$0xff]  ;;  %v2162_v18 = vld [vmem:[%s2462_s19 + $0x38] sm:$0xff]  }
  0x43   : > { %1960 = vmatprep.mubr.msk.bf16.mxu0 %vm2312_vm0, %v2311_v19  ;;  %1966 = vmatprep.mubr.msk.bf16.mxu1 %vm2312_vm0, %v2311_v19  ;;  %v2168_v31 = vld [vmem:[%s2462_s19 + $0x8] sm:$0xff]  }
  0x44   : > { %1955 = vmatpush3.bf16.msra.mxu0 %v586_v25  ;;  %v2165_v25 = vld [vmem:[%s2462_s19 + $0x20] sm:$0xff]  }
  0x45   : > { %555 = vperm.xlu1 %2161, %v2486_v3   ;;  %549 = vperm.xlu0 %2160, %v2476_v1  }
  0x46   : > { %1956 = vmatprep.subr.bf16.mxu0 %v2311_v19 }
  0x48   : > { %1957 = vmatpush3.bf16.msra.mxu0 %v585_v27  ;;  %v2166_v27 = vld [vmem:[%s2462_s19 + $0x18] sm:$0xff]  }
  0x49   : > { %561 = vperm.xlu1 %2161, %v2496_v5   ;;  %558 = vperm.xlu0 %2160, %v2491_v4  }
  0x4a   : > { %1958 = vmatprep.subr.bf16.mxu0 %v2311_v19 }
  0x4c   : > { %1959 = vmatpush3.bf16.msra.mxu0 %v584_v30  ;;  %v2167_v30 = vld [vmem:[%s2462_s19 + $0x10] sm:$0xff]  }
  0x4d   : > { %652 = vperm.xlu1 %2161, %v648_v20   ;;  %v2163_v20 = vld [vmem:[%s2462_s19 + $0x30] sm:$0xff]  }
  0x51   : > { %657 = vperm.xlu1 %2161, %v649_v21   ;;  %v2164_v21 = vld [vmem:[%s2462_s19 + $0x28] sm:$0xff]  }
  0x55   : > { %874 = vperm.xlu1 %2161, %v511_v6  }
  0x59   : > { %877 = vperm.xlu1 %2161, %v512_v7  }
  0x5d   : > { %880 = vperm.xlu1 %2161, %v513_v8  }
  0x61   : > { %883 = vperm.xlu1 %2161, %v514_v9  }
  0x65   : > { %886 = vperm.xlu1 %2161, %v515_v10  }
  0x69   : > { %889 = vperm.xlu1 %2161, %v516_v11  }
  0xbc   : > { %v553_v33 = vpop.permute.xlu1 %552  ;;  %v547_v34 = vpop.permute.xlu0 %546 }
  0xbd   : > { %vm563_vm1 = vcmp.eq.s32.totalorder %v547_v34, %v544_v32  ;;  %vm565_vm2 = vcmp.eq.s32.totalorder %v553_v33, %v544_v32 }
  0xbe   : > { %v1818_v37 = vsel %vm563_vm1, 1.0, %v2311_v19  ;;  %v1820_v40 = vsel %vm565_vm2, 1.0, %v2311_v19  ;;  %vm1008_vm1 = vcmask 162816  }
  0xc0   : > { %v556_v35 = vpop.permute.xlu1 %555  ;;  %v550_v36 = vpop.permute.xlu0 %549 }
  0xc1   : > { %vm566_vm3 = vcmp.eq.s32.totalorder %v556_v35, %v544_v32  ;;  %vm564_vm4 = vcmp.eq.s32.totalorder %v550_v36, %v544_v32 }
  0xc2   : > { %v1819_v38 = vsel %vm564_vm4, 1.0, %v2311_v19  ;;  %v1821_v41 = vsel %vm566_vm3, 1.0, %v2311_v19 }
  0xc3   : > { %v581_v39 = vpack.c.bf16 %v1819_v38, %v1818_v37  ;;  %v582_v44 = vpack.c.bf16 %v1821_v41, %v1820_v40 }
  0xc4   : > { %v562_v42 = vpop.permute.xlu1 %561  ;;  %v559_v43 = vpop.permute.xlu0 %558 }
  0xc5   : > { %vm568_vm5 = vcmp.eq.s32.totalorder %v562_v42, %v544_v32  ;;  %vm567_vm6 = vcmp.eq.s32.totalorder %v559_v43, %v544_v32  ;;  %587 = vxpose.xlu0.c.b16.start [1/3] (short) (narrow) %v581_v39, 16 }
  0xc6   : > { %v1823_v45 = vsel %vm568_vm5, 1.0, %v2311_v19  ;;  %v1822_v46 = vsel %vm567_vm6, 1.0, %v2311_v19 }
  0xc7   : > { %v2563_v48 = vpack.c.bf16 %v1823_v45, %v1822_v46 }
  0xc8   : > { %v653_v47 = vpop.permute.xlu1 %652 }
  0xc9   : > { %588 = vxpose.xlu0.c.b16.cont [2/3] (short) (narrow) %v582_v44, 16 }
  0xcc   : > { %v658_v49 = vpop.permute.xlu1 %657 }
  0xcd   : > { %589 = vxpose.xlu0.c.b16.end [3/3] (short) (narrow) %v2563_v48, 16 }
  0xd0   : > { %v875_v50 = vpop.permute.xlu1 %874 }
  0xd1   : > { %vm891_vm7 = vcmp.eq.s32.totalorder %v875_v50, %v544_v32 }
  0xd2   : > { %v1837_v53 = vsel %vm891_vm7, 1.0, %v2311_v19 }
  0xd4   : > { %v878_v52 = vpop.permute.xlu1 %877 }
  0xd5   : > { %vm892_vm8 = vcmp.eq.s32.totalorder %v878_v52, %v544_v32 }
  0xd6   : > { %v1838_v54 = vsel %vm892_vm8, 1.0, %v2311_v19  ;;  %1000 = vperm.xlu0 %2160, %v987_v51  }
  0xd7   : > { %v2571_v55 = vpack.c.bf16 %v1838_v54, %v1837_v53 }
  0xd8   : > { %v881_v57 = vpop.permute.xlu1 %880 }
  0xd9   : > { %915 = vxpose.xlu1.c.b16.start [1/3] (short) (narrow) %v2571_v55, 32  ;;  %vm893_vm9 = vcmp.eq.s32.totalorder %v881_v57, %v544_v32 }
  0xda   : > { %990 = vperm.xlu0 %2160, %v985_v56   ;;  %v1839_v60 = vsel %vm893_vm9, 1.0, %v2311_v19 }
  0xdc   : > { %v884_v59 = vpop.permute.xlu1 %883 }
  0xdd   : > { %vm894_vm10 = vcmp.eq.s32.totalorder %v884_v59, %v544_v32 }
  0xde   : > { %v1840_v61 = vsel %vm894_vm10, 1.0, %v2311_v19  ;;  %995 = vperm.xlu0 %2160, %v986_v58   ;;  %v1828_v58 = vld [vmem:[%s503_s22] ss:$0 sm:$0xff] }
  0xdf   : > { %v2582_v62 = vpack.c.bf16 %v1840_v61, %v1839_v60 }
  0xe0   : > { %v887_v63 = vpop.permute.xlu1 %886 }
  0xe1   : > { %916 = vxpose.xlu1.c.b16.cont [2/3] (short) (narrow) %v2582_v62, 32  ;;  %vm895_vm11 = vcmp.eq.s32.totalorder %v887_v63, %v544_v32 }
  0xe2   : > { %v1841_v7 = vsel %vm895_vm11, 1.0, %v2311_v19 }
  0xe4   : > { %v890_v6 = vpop.permute.xlu1 %889 }
  0xe5   : > { %vm896_vm12 = vcmp.eq.s32.totalorder %v890_v6, %v544_v32  ;;  %v2169_v32 = vld [vmem:[%s2462_s19] sm:$0xff]  }
  0xe6   : > { %v1842_v8 = vsel %vm896_vm12, 1.0, %v2311_v19 }
  0xe7   : > { %v2587_v9 = vpack.c.bf16 %v1842_v8, %v1841_v7 }
  0xe9   : > { %917 = vxpose.xlu1.c.b16.end [3/3] (short) (narrow) %v2587_v9, 32 }
 0x127   : > { %v595_v10 = vpop.trf.xlu0 }
 0x128   : > { %1961 = vmatmul.mubr.msk.bf16.vlgmr.msra.gmra.mxu0 %vm603_vm13, %v595_v10 }
 0x1e8   : > { %v641_v11 = vpop.f32.mrf.mxu0 }
 0x1e9   : > { %v660_v14 = vmul.f32 %v653_v47, %v641_v11 }
 0x1ea   : > { %v1962_v12 = vpop.f32.mrf.mxu0 }
 0x1ec   : > { %v644_v13 = vpop.f32.mrf.mxu0 }
 0x1ed   : > { %v661_v15 = vmul.f32 %v658_v49, %v644_v13 }
 0x1ee   : > { %v1963_v16 = vpop.f32.mrf.mxu0 }
 0x1ef   : > { %v662_v17 = vpack.c.bf16 %v661_v15, %v660_v14 }
 0x1f1   : > { %1965 = vmatpush3.bf16.msra.mxu1 %v662_v17 }
 0x1f2   : > { %1978 = vmatprep.subr.bf16.mxu1 %v2311_v19 }
 0x1f4   : > { %1967 = vmatmul.mubr.msk.bf16.vlgmr.msra.gmra.mxu1 %vm663_vm14, %v581_v39 }
 0x1f5   : > { %1970 = vmatprep.mubr.msk.bf16.mxu1 %vm2312_vm0, %v2311_v19  ;;  %1979 = vmatpush3.bf16.msra.mxu1 %v2162_v18 }
 0x1f6   : > { %1980 = vmatprep.subr.bf16.mxu1 %v2311_v19 }
 0x1f9   : > { %1981 = vmatpush3.bf16.msra.mxu1 %v2163_v20 }
 0x1fa   : > { %1982 = vmatprep.subr.bf16.mxu1 %v2311_v19 }
 0x1fc   : > { %1971 = vmatmul.mubr.msk.bf16.gmra.mxu1 %vm663_vm14, %v582_v44 }
 0x1fd   : > { %1974 = vmatprep.mubr.msk.bf16.mxu1 %vm2312_vm0, %v2311_v19  ;;  %1983 = vmatpush3.bf16.msra.mxu1 %v2164_v21 }
 0x1fe   : > { %1984 = vmatprep.subr.bf16.mxu1 %v2311_v19 }
 0x201   : > { %1985 = vmatpush3.bf16.msra.mxu1 %v2165_v25 }
 0x202   : > { %1986 = vmatprep.subr.bf16.mxu1 %v2311_v19 }
 0x204   : > { %1975 = vmatmul.mubr.msk.bf16.gmra.mxu1 %vm663_vm14, %v2563_v48  ;;  %v923_v48 = vpop.trf.xlu1 }
 0x205   : > { %1987 = vmatpush3.bf16.msra.mxu1 %v2166_v27  ;;  %1994 = vmatprep.mubr.msk.bf16.mxu1 %vm2312_vm0, %v2311_v19 }
 0x206   : > { %1988 = vmatprep.subr.bf16.mxu1 %v2311_v19  ;;  %2012 = vmatprep.mubr.msk.bf16.mxu0 %vm603_vm13, %v923_v48 }
 0x209   : > { %1989 = vmatpush3.bf16.msra.mxu1 %v2167_v30 }
 0x20a   : > { %1990 = vmatprep.subr.bf16.mxu1 %v2311_v19 }
 0x20d   : > { %1991 = vmatpush3.bf16.msra.mxu1 %v2168_v31 }
 0x20e   : > { %1992 = vmatprep.subr.bf16.mxu1 %v2311_v19 }
 0x211   : > { %1993 = vmatpush3.bf16.msra.mxu1 %v2169_v32 }
 0x2b4   : > { %v707_v33 = vpop.f32.mrf.mxu1 }
 0x2b6   : > { %v1968_v34 = vpop.f32.mrf.mxu1 }
 0x2b8   : > { %v710_v35 = vpop.f32.mrf.mxu1 }
 0x2b9   : > { %v730_v36 = vpack.c.bf16 %v710_v35, %v707_v33 }
 0x2ba   : > { %v1969_v37 = vpop.f32.mrf.mxu1 }
 0x2bb   : > { %1995 = vmatmul.mubr.bf16.vlgmr.msra.gmra.mxu1 %v730_v36 }
 0x2bc   : > { %v715_v38 = vpop.f32.mrf.mxu1  ;;  %1998 = vmatprep.mubr.msk.bf16.mxu1 %vm2312_vm0, %v2311_v19 }
 0x2be   : > { %v1972_v39 = vpop.f32.mrf.mxu1 }
 0x2c0   : > { %v718_v40 = vpop.f32.mrf.mxu1 }
 0x2c1   : > { %v731_v41 = vpack.c.bf16 %v718_v40, %v715_v38 }
 0x2c2   : > { %v1973_v42 = vpop.f32.mrf.mxu1 }
 0x2c3   : > { %1999 = vmatmul.mubr.bf16.gmra.mxu1 %v731_v41 }
 0x2c4   : > { %v723_v43 = vpop.f32.mrf.mxu1  ;;  %2002 = vmatprep.mubr.msk.bf16.mxu1 %vm2312_vm0, %v2311_v19 }
 0x2c6   : > { %v1976_v44 = vpop.f32.mrf.mxu1 }
 0x2c8   : > { %v726_v45 = vpop.f32.mrf.mxu1 }
 0x2c9   : > { %v732_v46 = vpack.c.bf16 %v726_v45, %v723_v43 }
 0x2ca   : > { %v1977_v47 = vpop.f32.mrf.mxu1 }
 0x2cb   : > { %2003 = vmatmul.mubr.bf16.gmra.mxu1 %v732_v46 }
 0x37b   : > { %v838_v49 = vpop.f32.mrf.mxu1 }
 0x37c   : > { %v839_v14 = vadd.f32 %v1828_v58, %v838_v49 }
 0x37d   : > { %v1996_v50 = vpop.f32.mrf.mxu1 }
 0x37e   : > { %v861_v25 = vmax.f32 %v839_v14, 0.0 }
 0x37f   : > { %v841_v51 = vpop.f32.mrf.mxu1 }
 0x380   : > { %v842_v8 = vadd.f32 %v1828_v58, %v841_v51  ;;  %v867_v33 = vadd.f32 %v861_v25, %v2550_v28 }
 0x381   : > { %v1997_v52 = vpop.f32.mrf.mxu1 }
 0x382   : > { %v862_v17 = vmax.f32 %v842_v8, 0.0 }
 0x383   : > { %v846_v53 = vpop.f32.mrf.mxu1 }
 0x384   : > { %v847_v6 = vadd.f32 %v1828_v58, %v846_v53  ;;  %v868_v31 = vadd.f32 %v862_v17, %v2552_v29 }
 0x385   : > { %v2000_v54 = vpop.f32.mrf.mxu1 }
 0x386   : > { %v863_v15 = vmax.f32 %v847_v6, 0.0  ;;  %v912_v34 = vpack.c.bf16 %v868_v31, %v867_v33 }
 0x387   : > { %v849_v56 = vpop.f32.mrf.mxu1 }
 0x388   : > { %v850_v60 = vadd.f32 %v1828_v58, %v849_v56  ;;  %v869_v27 = vadd.f32 %v863_v15, %v2537_v24 }
 0x389   : > { %v2001_v57 = vpop.f32.mrf.mxu1 }
 0x38a   : > { %v864_v10 = vmax.f32 %v850_v60, 0.0 }
 0x38b   : > { %v854_v59 = vpop.f32.mrf.mxu1 }
 0x38c   : > { %v855_v61 = vadd.f32 %v1828_v58, %v854_v59  ;;  %v870_v18 = vadd.f32 %v864_v10, %v2541_v26  ;;  %v924_v26 = vpop.trf.xlu1 }
 0x38d   : > { %v2004_v63 = vpop.f32.mrf.mxu1 }
 0x38e   : > { %v865_v11 = vmax.f32 %v855_v61, 0.0  ;;  %v913_v32 = vpack.c.bf16 %v870_v18, %v869_v27 }
 0x38f   : > { %v857_v7 = vpop.f32.mrf.mxu1 }
 0x390   : > { %v858_v12 = vadd.f32 %v1828_v58, %v857_v7  ;;  %v871_v20 = vadd.f32 %v865_v11, %v2533_v22  ;;  %v1001_v22 = vpop.permute.xlu0 %1000 }
 0x391   : > { %v2005_v13 = vpop.f32.mrf.mxu1 }
 0x392   : > { %v866_v16 = vmax.f32 %v858_v12, 0.0 }
 0x394   : > { %v872_v21 = vadd.f32 %v866_v16, %v2535_v23  ;;  %v991_v23 = vpop.permute.xlu0 %990 }
 0x396   : > { %v914_v30 = vpack.c.bf16 %v872_v21, %v871_v20 }
 0x398   : > { %2006 = vmatprep.subr.bf16.mxu0 %v914_v30  ;;  %v996_v38 = vpop.permute.xlu0 %995 }
 0x399   : > { %2007 = vmatpush3.bf16.msra.mxu0 %v914_v30 }
 0x39a   : > { %2008 = vmatprep.subr.bf16.mxu0 %v913_v32 }
 0x39d   : > { %2009 = vmatpush3.bf16.msra.mxu0 %v913_v32 }
 0x39e   : > { %2010 = vmatprep.subr.bf16.mxu0 %v912_v34 }
 0x3a1   : > { %2011 = vmatpush3.bf16.msra.mxu0 %v912_v34 }
 0x3a2   : > { %2016 = vmatprep.subr.bf16.mxu0 %v2311_v19 }
 0x3a4   : > { %2013 = vmatmul.mubr.msk.bf16.vlgmr.msra.gmra.mxu0 %vm603_vm13, %v924_v26 }
 0x3a5   : > { %2020 = vmatprep.mubr.msk.bf16.mxu0 %vm2312_vm0, %v2311_v19 }
 0x464   : > { %v2014_v24 = vpop.f32.mrf.mxu0 }
 0x465   : > { %v1005_v29 = vmul.f32 %v2014_v24, %v1001_v22 }
 0x466   : > { %v971_v35 = vpop.f32.mrf.mxu0 }
 0x467   : > { %v1007_v28 = vpack.c.bf16 %v1005_v29, %v1005_v29  ;;  %v1003_v40 = vmul.f32 %v991_v23, %v971_v35 }
 0x468   : > { %v2015_v36 = vpop.f32.mrf.mxu0 }
 0x469   : > { %v1020_v37 = vsel %vm1018_vm15, %v1007_v28, 0 }
 0x46a   : > { %v974_v39 = vpop.f32.mrf.mxu0  ;;  %2017 = vmatpush3.bf16.msra.mxu0 %v1020_v37 }
 0x46b   : > { %v1004_v41 = vmul.f32 %v996_v38, %v974_v39  ;;  %2018 = vmatprep.subr.bf16.mxu0 %v2311_v19 }
 0x46d   : > { %v1006_v42 = vpack.c.bf16 %v1004_v41, %v1003_v40 }
 0x46f   : > { %2019 = vmatpush3.bf16.msra.mxu0 %v1006_v42 }
 0x472   : > { %2021 = vmatmul.mubr.msk.bf16.vlgmr.msra.gmra.mxu0 %vm1008_vm1, %v2571_v55 }
 0x473   : > { %2024 = vmatprep.mubr.msk.bf16.mxu0 %vm2312_vm0, %v2311_v19 }
 0x47a   : > { %2025 = vmatmul.mubr.msk.bf16.gmra.mxu0 %vm1008_vm1, %v2582_v62 }
 0x47b   : > { %2028 = vmatprep.mubr.msk.bf16.mxu0 %vm2312_vm0, %v2311_v19 }
 0x482   : > { %2029 = vmatmul.mubr.msk.bf16.gmra.mxu0 %vm1008_vm1, %v2587_v9 }
 0x532   : > { %v1056_v43 = vpop.f32.mrf.mxu0 }
 0x533   : > { %1079 = vst [vmem:[#allocation7] sm:$0xff] %v1056_v43 }
 0x534   : > { %v2022_v44 = vpop.f32.mrf.mxu0 }
 0x536   : > { %v1059_v45 = vpop.f32.mrf.mxu0 }
 0x537   : > { %1080 = vst [vmem:[#allocation7 + $0x8] sm:$0xff] %v1059_v45 }
 0x538   : > { %v2023_v46 = vpop.f32.mrf.mxu0 }
 0x53a   : > { %v1064_v47 = vpop.f32.mrf.mxu0 }
 0x53b   : > { %1081 = vst [vmem:[#allocation7 + $0x10] sm:$0xff] %v1064_v47 }
 0x53c   : > { %v2026_v48 = vpop.f32.mrf.mxu0 }
 0x53e   : > { %v1067_v55 = vpop.f32.mrf.mxu0 }
 0x53f   : > { %1082 = vst [vmem:[#allocation7 + $0x18] sm:$0xff] %v1067_v55 }
 0x540   : > { %v2027_v49 = vpop.f32.mrf.mxu0 }
 0x542   : > { %v1072_v50 = vpop.f32.mrf.mxu0 }
 0x543   : > { %1083 = vst [vmem:[#allocation7 + $0x20] sm:$0xff] %v1072_v50 }
 0x544   : > { %v2030_v62 = vpop.f32.mrf.mxu0 }
 0x546   : > { %v1075_v51 = vpop.f32.mrf.mxu0 }
 0x547   : > { %1084 = vst [vmem:[#allocation7 + $0x28] sm:$0xff] %v1075_v51 }
 0x548   : > { %v2031_v19 = vpop.f32.mrf.mxu0 }
 0x549 PF: > { %v1093_v9 = vld [vmem:[%s2846_s2 + $0x10] sm:$0xff]  ;;  %v1091_v52 = vld [vmem:[%s2846_s2] sm:$0xff]  ;;  %v2313_v53 = vmov 0   ;;  %v1094_v54 = vld [vmem:[%s2846_s2 + $0x18] sm:$0xff]  ;;  %v2314_v57 = vmov 0.0   ;;  %v1099_v30 = vlaneseq  ;;  %vm1224_vm5 = vcmask 392192   ;;  %s2863_s29 = scalar_lea.vmem %s2853_s9, %s2447_s24 }
 0x54a   : > { %2171 = vset.pattern.permute.xlu1 %v2313_v53  ;;  %2170 = vset.pattern.permute.xlu0 %v2313_v53  ;;  %v1092_v56 = vld [vmem:[%s2846_s2 + $0x8] sm:$0xff]  ;;  %v1095_v59 = vld [vmem:[%s2846_s2 + $0x20] sm:$0xff]  ;;  %v2664_v60 = vld [vmem:[#allocation7 + $0x20] sm:$0xff]  ;;  %p1880_p6 = scmp.ne.s32.totalorder %s2399_s26, 1 }
 0x54b   : > { %1108 = vperm.xlu1 %2171, %v1093_v9   ;;  %1102 = vperm.xlu0 %2170, %v1091_v52   ;;  %v1096_v58 = vld [vmem:[%s2846_s2 + $0x28] sm:$0xff]  ;;  %v2670_v6 = vld [vmem:[#allocation7 + $0x10] sm:$0xff]  ;;  %v2674_v8 = vld [vmem:[#allocation7] sm:$0xff]  ;;  %v2713_v31 = vand.u32 127, %v1099_v30 }
 0x54c   : > { %2066 = vmatprep.subr.bf16.mxu0 %v2314_v57  ;;  %v2672_v7 = vld [vmem:[#allocation7 + $0x18] sm:$0xff]  ;;  %v2678_v11 = vld [vmem:[#allocation7 + $0x8] sm:$0xff]  ;;  %v1097_v13 = vld [vmem:[%s2846_s2 + $0x30] sm:$0xff] }
 0x54d   : > { %v1214_v10 = vpack.c.bf16 %v2672_v7, %v2670_v6  ;;  %v1098_v12 = vld [vmem:[%s2846_s2 + $0x38] sm:$0xff]  ;;  %v1213_v14 = vpack.c.bf16 %v2678_v11, %v2674_v8  ;;  %v1154_v15 = vld [vmem:[%s2847_s3 + $0x8] sm:$0xff]  ;;  %v1153_v16 = vld [vmem:[%s2847_s3] sm:$0xff] }
 0x54e   : > { %v2666_v61 = vld [vmem:[#allocation7 + $0x28] sm:$0xff]  ;;  %v1155_v18 = vld [vmem:[%s2847_s3 + $0x10] sm:$0xff]  ;;  %v1158_v20 = vld [vmem:[%s2847_s3 + $0x28] sm:$0xff] }
 0x54f   : > { %1111 = vperm.xlu1 %2171, %v1094_v54   ;;  %1105 = vperm.xlu0 %2170, %v1092_v56   ;;  %v1215_v63 = vpack.c.bf16 %v2666_v61, %v2664_v60  ;;  %v1156_v17 = vld [vmem:[%s2847_s3 + $0x18] sm:$0xff]  ;;  %v1157_v21 = vld [vmem:[%s2847_s3 + $0x20] sm:$0xff]  ;;  %v1159_v27 = vld [vmem:[%s2847_s3 + $0x30] sm:$0xff] }
 0x550   : > { %v1160_v25 = vld [vmem:[%s2847_s3 + $0x38] sm:$0xff] }
 0x551   : > { %2032 = vmatprep.subr.bf16.mxu1 %v1215_v63 }
 0x552   : > { %2033 = vmatpush3.bf16.msra.mxu1 %v1215_v63 }
 0x553   : > { %1117 = vperm.xlu1 %2171, %v1096_v58   ;;  %1114 = vperm.xlu0 %2170, %v1095_v59  }
 0x554   : > { %2034 = vmatprep.subr.bf16.mxu1 %v1214_v10 }
 0x556   : > { %2035 = vmatpush3.bf16.msra.mxu1 %v1214_v10 }
 0x557   : > { %1123 = vperm.xlu1 %2171, %v1098_v12   ;;  %1120 = vperm.xlu0 %2170, %v1097_v13  }
 0x558   : > { %2036 = vmatprep.subr.bf16.mxu1 %v1213_v14 }
 0x55a   : > { %2037 = vmatpush3.bf16.msra.mxu1 %v1213_v14  ;;  %v2172_v14 = vld [vmem:[%s2457_s16 + $0x38] sm:$0xff]  }
 0x55b   : > { %1165 = vperm.xlu1 %2171, %v1154_v15   ;;  %1162 = vperm.xlu0 %2170, %v1153_v16   ;;  %v2173_v15 = vld [vmem:[%s2457_s16 + $0x30] sm:$0xff]   ;;  %v2174_v16 = vld [vmem:[%s2457_s16 + $0x28] sm:$0xff]  }
 0x55c   : > { %2046 = vmatprep.subr.bf16.mxu1 %v2314_v57  ;;  %2067 = vmatpush3.bf16.msra.mxu0 %v2172_v14 }
 0x55d   : > { %2068 = vmatprep.subr.bf16.mxu0 %v2314_v57 }
 0x55f   : > { %1171 = vperm.xlu1 %2171, %v1156_v17   ;;  %1168 = vperm.xlu0 %2170, %v1155_v18   ;;  %v2175_v17 = vld [vmem:[%s2457_s16 + $0x20] sm:$0xff]   ;;  %v2176_v18 = vld [vmem:[%s2457_s16 + $0x18] sm:$0xff]  }
 0x560   : > { %2069 = vmatpush3.bf16.msra.mxu0 %v2173_v15 }
 0x561   : > { %2070 = vmatprep.subr.bf16.mxu0 %v2314_v57 }
 0x563   : > { %1177 = vperm.xlu1 %2171, %v1158_v20   ;;  %1174 = vperm.xlu0 %2170, %v1157_v21   ;;  %v2177_v20 = vld [vmem:[%s2457_s16 + $0x10] sm:$0xff]  }
 0x564   : > { %2071 = vmatpush3.bf16.msra.mxu0 %v2174_v16 }
 0x565   : > { %2072 = vmatprep.subr.bf16.mxu0 %v2314_v57 }
 0x567   : > { %1183 = vperm.xlu1 %2171, %v1160_v25   ;;  %1180 = vperm.xlu0 %2170, %v1159_v27  }
 0x568   : > { %2073 = vmatpush3.bf16.msra.mxu0 %v2175_v17 }
 0x569   : > { %2074 = vmatprep.subr.bf16.mxu0 %v2314_v57 }
 0x56c   : > { %2075 = vmatpush3.bf16.msra.mxu0 %v2176_v18 }
 0x56d   : > { %2076 = vmatprep.subr.bf16.mxu0 %v2314_v57 }
 0x570   : > { %2077 = vmatpush3.bf16.msra.mxu0 %v2177_v20 }
 0x571   : > { %2078 = vmatprep.subr.bf16.mxu0 %v2314_v57 }
 0x5c6   : > { %v1109_v32 = vpop.permute.xlu1 %1108  ;;  %v1103_v33 = vpop.permute.xlu0 %1102 }
 0x5c7   : > { %vm1127_vm0 = vcmp.eq.s32.totalorder %v1109_v32, %v2713_v31  ;;  %vm1125_vm2 = vcmp.eq.s32.totalorder %v1103_v33, %v2713_v31  ;;  %v1222_v32 = vld [vmem:[#allocation5 + $0x30] sm:$0xff] }
 0x5c8   : > { %v1850_v22 = vsel %vm1127_vm0, 1.0, %v2314_v57  ;;  %v1848_v23 = vsel %vm1125_vm2, 1.0, %v2314_v57  ;;  %vm2315_vm2 = vmmov 0  }
 0x5c9   : > { %2082 = vmatprep.mubr.msk.bf16.mxu0 %vm2315_vm2, %v2314_v57 }
 0x5ca   : > { %v1112_v34 = vpop.permute.xlu1 %1111  ;;  %v1106_v26 = vpop.permute.xlu0 %1105 }
 0x5cb   : > { %vm1128_vm3 = vcmp.eq.s32.totalorder %v1112_v34, %v2713_v31  ;;  %vm1126_vm4 = vcmp.eq.s32.totalorder %v1106_v26, %v2713_v31  ;;  %v1223_v26 = vld [vmem:[#allocation5 + $0x38] sm:$0xff] }
 0x5cc   : > { %v1851_v24 = vsel %vm1128_vm3, 1.0, %v2314_v57  ;;  %v1849_v29 = vsel %vm1126_vm4, 1.0, %v2314_v57  ;;  %vm1330_vm3 = vcmask 523264  }
 0x5cd   : > { %v1150_v35 = vpack.c.bf16 %v1851_v24, %v1850_v22  ;;  %v1149_v28 = vpack.c.bf16 %v1849_v29, %v1848_v23  ;;  %v1220_v23 = vld [vmem:[#allocation5 + $0x20] sm:$0xff]  ;;  %v1221_v29 = vld [vmem:[#allocation5 + $0x28] sm:$0xff] }
 0x5ce   : > { %v1118_v36 = vpop.permute.xlu1 %1117  ;;  %v1115_v37 = vpop.permute.xlu0 %1114 }
 0x5cf   : > { %vm1130_vm6 = vcmp.eq.s32.totalorder %v1118_v36, %v2713_v31  ;;  %vm1129_vm7 = vcmp.eq.s32.totalorder %v1115_v37, %v2713_v31  ;;  %2038 = vmatprep.mubr.msk.bf16.mxu1 %vm1224_vm5, %v1149_v28  ;;  %v1219_v28 = vld [vmem:[#allocation5 + $0x18] sm:$0xff] }
 0x5d0   : > { %v1853_v38 = vsel %vm1130_vm6, 1.0, %v2314_v57  ;;  %v1852_v39 = vsel %vm1129_vm7, 1.0, %v2314_v57  ;;  %2039 = vmatmul.mubr.msk.bf16.vlgmr.msra.gmra.mxu1 %vm1224_vm5, %v1150_v35 }
 0x5d1   : > { %v1151_v40 = vpack.c.bf16 %v1853_v38, %v1852_v39 }
 0x5d2   : > { %v1124_v41 = vpop.permute.xlu1 %1123  ;;  %v1121_v42 = vpop.permute.xlu0 %1120 }
 0x5d3   : > { %vm1132_vm8 = vcmp.eq.s32.totalorder %v1124_v41, %v2713_v31  ;;  %vm1131_vm9 = vcmp.eq.s32.totalorder %v1121_v42, %v2713_v31  ;;  %2042 = vmatprep.mubr.msk.bf16.mxu1 %vm1224_vm5, %v1151_v40  ;;  %v1218_v41 = vld [vmem:[#allocation5 + $0x10] sm:$0xff] }
 0x5d4   : > { %v1855_v43 = vsel %vm1132_vm8, 1.0, %v2314_v57  ;;  %v1854_v44 = vsel %vm1131_vm9, 1.0, %v2314_v57 }
 0x5d5   : > { %v1152_v45 = vpack.c.bf16 %v1855_v43, %v1854_v44 }
 0x5d6   : > { %v1166_v46 = vpop.permute.xlu1 %1165  ;;  %v1163_v47 = vpop.permute.xlu0 %1162 }
 0x5d7   : > { %vm1186_vm10 = vcmp.eq.s32.totalorder %v1166_v46, %v2713_v31  ;;  %vm1185_vm11 = vcmp.eq.s32.totalorder %v1163_v47, %v2713_v31 }
 0x5d8   : > { %v1857_v48 = vsel %vm1186_vm10, 1.0, %v2314_v57  ;;  %v1856_v55 = vsel %vm1185_vm11, 1.0, %v2314_v57  ;;  %2043 = vmatmul.mubr.msk.bf16.gmra.mxu1 %vm1224_vm5, %v1152_v45  ;;  %v1217_v45 = vld [vmem:[#allocation5 + $0x8] sm:$0xff] }
 0x5d9   : > { %v1209_v49 = vpack.c.bf16 %v1857_v48, %v1856_v55  ;;  %2054 = vmatprep.mubr.msk.bf16.mxu1 %vm2315_vm2, %v2314_v57  ;;  %v1216_v48 = vld [vmem:[#allocation5] sm:$0xff] }
 0x5da   : > { %v1172_v50 = vpop.permute.xlu1 %1171  ;;  %v1169_v62 = vpop.permute.xlu0 %1168 }
 0x5db   : > { %vm1188_vm12 = vcmp.eq.s32.totalorder %v1172_v50, %v2713_v31  ;;  %vm1187_vm13 = vcmp.eq.s32.totalorder %v1169_v62, %v2713_v31  ;;  %1314 = vxpose.xlu0.c.b16.start [1/4] (short) (narrow) %v1209_v49, 48 }
 0x5dc   : > { %v1859_v51 = vsel %vm1188_vm12, 1.0, %v2314_v57  ;;  %v1858_v19 = vsel %vm1187_vm13, 1.0, %v2314_v57 }
 0x5dd   : > { %v1210_v9 = vpack.c.bf16 %v1859_v51, %v1858_v19 }
 0x5de   : > { %v1178_v52 = vpop.permute.xlu1 %1177  ;;  %v1175_v53 = vpop.permute.xlu0 %1174 }
 0x5df   : > { %vm1190_vm14 = vcmp.eq.s32.totalorder %v1178_v52, %v2713_v31  ;;  %vm1189_vm15 = vcmp.eq.s32.totalorder %v1175_v53, %v2713_v31  ;;  %1315 = vxpose.xlu0.c.b16.cont [2/4] (short) (narrow) %v1210_v9, 48 }
 0x5e0   : > { %v1861_v54 = vsel %vm1190_vm14, 1.0, %v2314_v57  ;;  %v1860_v56 = vsel %vm1189_vm15, 1.0, %v2314_v57 }
 0x5e1   : > { %v1211_v58 = vpack.c.bf16 %v1861_v54, %v1860_v56 }
 0x5e2   : > { %v1184_v59 = vpop.permute.xlu1 %1183  ;;  %v1181_v63 = vpop.permute.xlu0 %1180 }
 0x5e3   : > { %vm1192_vm1 = vcmp.eq.s32.totalorder %v1184_v59, %v2713_v31  ;;  %vm1191_vm0 = vcmp.eq.s32.totalorder %v1181_v63, %v2713_v31  ;;  %1316 = vxpose.xlu0.c.b16.cont [3/4] (short) (narrow) %v1211_v58, 48  ;;  %v2178_v59 = vld [vmem:[%s2457_s16 + $0x8] sm:$0xff]   ;;  %v2179_v63 = vld [vmem:[%s2457_s16] sm:$0xff]  }
 0x5e4   : > { %v1863_v10 = vsel %vm1192_vm1, 1.0, %v2314_v57  ;;  %v1862_v12 = vsel %vm1191_vm0, 1.0, %v2314_v57  ;;  %2079 = vmatpush3.bf16.msra.mxu0 %v2178_v59 }
 0x5e5   : > { %v1212_v13 = vpack.c.bf16 %v1863_v10, %v1862_v12  ;;  %2080 = vmatprep.subr.bf16.mxu0 %v2314_v57 }
 0x5e7   : > { %1317 = vxpose.xlu0.c.b16.end [4/4] (short) (narrow) %v1212_v13, 48 }
 0x5e8   : > { %2081 = vmatpush3.bf16.msra.mxu0 %v2179_v63 }
 0x63d   : > { %v1322_v54 = vpop.trf.xlu0 }
 0x641   : > { %v1323_v56 = vpop.trf.xlu0 }
 0x645   : > { %v1324_v58 = vpop.trf.xlu0 }
 0x690   : > { %v2040_v21 = vpop.f32.mrf.mxu1 }
 0x691   : > { %v1280_v46 = vadd.f32 %v2040_v21, %v1218_v41 }
 0x692   : > { %v1271_v25 = vpop.f32.mrf.mxu1 }
 0x693   : > { %v1304_v62 = vmax.f32 %v1280_v46, 0.0  ;;  %v1272_v51 = vadd.f32 %v1271_v25, %v1216_v48 }
 0x694   : > { %v2041_v27 = vpop.f32.mrf.mxu1 }
 0x695   : > { %v1283_v42 = vadd.f32 %v2041_v27, %v1219_v28  ;;  %v1302_v52 = vmax.f32 %v1272_v51, 0.0 }
 0x696   : > { %v1274_v30 = vpop.f32.mrf.mxu1 }
 0x697   : > { %v1305_v55 = vmax.f32 %v1283_v42, 0.0  ;;  %v1275_v49 = vadd.f32 %v1274_v30, %v1217_v45 }
 0x698   : > { %v2044_v33 = vpop.f32.mrf.mxu1 }
 0x699   : > { %v1296_v22 = vadd.f32 %v2044_v33, %v1222_v32  ;;  %v1311_v19 = vpack.c.bf16 %v1305_v55, %v1304_v62  ;;  %v1303_v9 = vmax.f32 %v1275_v49, 0.0 }
 0x69a   : > { %v1287_v34 = vpop.f32.mrf.mxu1 }
 0x69b   : > { %v1308_v37 = vmax.f32 %v1296_v22, 0.0  ;;  %v1288_v38 = vadd.f32 %v1287_v34, %v1220_v23  ;;  %v1310_v53 = vpack.c.bf16 %v1303_v9, %v1302_v52 }
 0x69c   : > { %v2045_v24 = vpop.f32.mrf.mxu1 }
 0x69d   : > { %v1299_v35 = vadd.f32 %v2045_v24, %v1223_v26  ;;  %v1306_v47 = vmax.f32 %v1288_v38, 0.0 }
 0x69e   : > { %v1290_v36 = vpop.f32.mrf.mxu1 }
 0x69f   : > { %v1309_v39 = vmax.f32 %v1299_v35, 0.0  ;;  %v1291_v40 = vadd.f32 %v1290_v36, %v1221_v29  ;;  %v1871_v35 = vld [vmem:[%s2863_s29] ss:$0 sm:$0xff] }
 0x6a1   : > { %v1313_v43 = vpack.c.bf16 %v1309_v39, %v1308_v37  ;;  %v1307_v44 = vmax.f32 %v1291_v40, 0.0 }
 0x6a3   : > { %2047 = vmatpush3.bf16.msra.mxu1 %v1313_v43  ;;  %v1312_v50 = vpack.c.bf16 %v1307_v44, %v1306_v47 }
 0x6a4   : > { %2048 = vmatprep.subr.bf16.mxu1 %v2314_v57 }
 0x6a7   : > { %2049 = vmatpush3.bf16.msra.mxu1 %v1312_v50 }
 0x6a8   : > { %2050 = vmatprep.subr.bf16.mxu1 %v2314_v57 }
 0x6ab   : > { %2051 = vmatpush3.bf16.msra.mxu1 %v1311_v19 }
 0x6ac   : > { %2052 = vmatprep.subr.bf16.mxu1 %v2314_v57 }
 0x6af   : > { %2053 = vmatpush3.bf16.msra.mxu1 %v1310_v53 }
 0x6b2   : > { %2055 = vmatmul.mubr.msk.bf16.vlgmr.msra.gmra.mxu1 %vm1330_vm3, %v1322_v54 }
 0x6b3   : > { %2058 = vmatprep.mubr.msk.bf16.mxu1 %vm2315_vm2, %v2314_v57 }
 0x6ba   : > { %2059 = vmatmul.mubr.msk.bf16.gmra.mxu1 %vm1330_vm3, %v1323_v56 }
 0x6bb   : > { %2062 = vmatprep.mubr.msk.bf16.mxu1 %vm2315_vm2, %v2314_v57 }
 0x6c2   : > { %2063 = vmatmul.mubr.msk.bf16.gmra.mxu1 %vm1330_vm3, %v1324_v58 }
 0x772   : > { %v1374_v10 = vpop.f32.mrf.mxu1 }
 0x773   : > { %v1397_v14 = vadd.f32 %v1374_v10, %v2674_v8 }
 0x774   : > { %v2056_v12 = vpop.f32.mrf.mxu1 }
 0x776   : > { %v1377_v13 = vpop.f32.mrf.mxu1 }
 0x777   : > { %v1398_v15 = vadd.f32 %v1377_v13, %v2678_v11 }
 0x778   : > { %v2057_v16 = vpop.f32.mrf.mxu1 }
 0x779   : > { %v1403_v17 = vpack.c.bf16 %v1398_v15, %v1397_v14 }
 0x77a   : > { %v1382_v18 = vpop.f32.mrf.mxu1 }
 0x77b   : > { %2083 = vmatmul.mubr.bf16.vlgmr.msra.gmra.mxu0 %v1403_v17  ;;  %v1399_v25 = vadd.f32 %v1382_v18, %v2670_v6 }
 0x77c   : > { %v2060_v20 = vpop.f32.mrf.mxu1  ;;  %2086 = vmatprep.mubr.msk.bf16.mxu0 %vm2315_vm2, %v2314_v57 }
 0x77e   : > { %v1385_v21 = vpop.f32.mrf.mxu1 }
 0x77f   : > { %v1400_v27 = vadd.f32 %v1385_v21, %v2672_v7 }
 0x780   : > { %v2061_v30 = vpop.f32.mrf.mxu1 }
 0x781   : > { %v1404_v32 = vpack.c.bf16 %v1400_v27, %v1399_v25 }
 0x782   : > { %v1390_v33 = vpop.f32.mrf.mxu1 }
 0x783   : > { %2087 = vmatmul.mubr.bf16.gmra.mxu0 %v1404_v32  ;;  %v1401_v22 = vadd.f32 %v1390_v33, %v2664_v60 }
 0x784   : > { %v2064_v34 = vpop.f32.mrf.mxu1  ;;  %2090 = vmatprep.mubr.msk.bf16.mxu0 %vm2315_vm2, %v2314_v57 }
 0x786   : > { %v1393_v26 = vpop.f32.mrf.mxu1 }
 0x787   : > { %v1402_v23 = vadd.f32 %v1393_v26, %v2666_v61 }
 0x788   : > { %v2065_v24 = vpop.f32.mrf.mxu1 }
 0x789   : > { %v1405_v29 = vpack.c.bf16 %v1402_v23, %v1401_v22 }
 0x78b   : > { %2091 = vmatmul.mubr.bf16.gmra.mxu0 %v1405_v29 }
 0x83b   : > { %v1511_v28 = vpop.f32.mrf.mxu0 }
 0x83c   : > { %v1512_v36 = vadd.f32 %v1871_v35, %v1511_v28 }
 0x83d   : > { %v2084_v37 = vpop.f32.mrf.mxu0 }
 0x83e   : > { %v1534_v38 = vmax.f32 %v1512_v36, 0.0 }
 0x83f   : > { %v1514_v39 = vpop.f32.mrf.mxu0 }
 0x840   : > { %v1540_v57 = vadd.f32 %v1534_v38, %v2674_v8  ;;  %v1515_v40 = vadd.f32 %v1871_v35, %v1514_v39 }
 0x841   : > { %v2085_v41 = vpop.f32.mrf.mxu0 }
 0x842   : > { %1546 = vst [vmem:[#allocation7] sm:$0xff] %v1540_v57  ;;  %v1535_v42 = vmax.f32 %v1515_v40, 0.0 }
 0x843   : > { %v1519_v43 = vpop.f32.mrf.mxu0 }
 0x844   : > { %v1541_v44 = vadd.f32 %v1535_v42, %v2678_v11  ;;  %v1520_v45 = vadd.f32 %v1871_v35, %v1519_v43 }
 0x845   : > { %v2088_v46 = vpop.f32.mrf.mxu0 }
 0x846   : > { %1547 = vst [vmem:[#allocation7 + $0x8] sm:$0xff] %v1541_v44  ;;  %v1536_v47 = vmax.f32 %v1520_v45, 0.0 }
 0x847   : > { %v1522_v48 = vpop.f32.mrf.mxu0 }
 0x848   : > { %v1542_v55 = vadd.f32 %v1536_v47, %v2670_v6  ;;  %v1523_v49 = vadd.f32 %v1871_v35, %v1522_v48 }
 0x849   : > { %v2089_v50 = vpop.f32.mrf.mxu0 }
 0x84a   : > { %1548 = vst [vmem:[#allocation7 + $0x10] sm:$0xff] %v1542_v55  ;;  %v1537_v62 = vmax.f32 %v1523_v49, 0.0 }
 0x84b   : > { %v1527_v51 = vpop.f32.mrf.mxu0 }
 0x84c   : > { %v1543_v8 = vadd.f32 %v1537_v62, %v2672_v7  ;;  %v1528_v19 = vadd.f32 %v1871_v35, %v1527_v51 }
 0x84d   : > { %v2092_v9 = vpop.f32.mrf.mxu0 }
 0x84e   : > { %1549 = vst [vmem:[#allocation7 + $0x18] sm:$0xff] %v1543_v8  ;;  %v1538_v52 = vmax.f32 %v1528_v19, 0.0 }
 0x84f   : > { %v1530_v53 = vpop.f32.mrf.mxu0 }
 0x850   : > { %v1544_v11 = vadd.f32 %v1538_v52, %v2664_v60  ;;  %v1531_v54 = vadd.f32 %v1871_v35, %v1530_v53 }
 0x851   : > { %v2093_v56 = vpop.f32.mrf.mxu0 }
 0x852   : > { %1550 = vst [vmem:[#allocation7 + $0x20] sm:$0xff] %v1544_v11  ;;  %v1539_v58 = vmax.f32 %v1531_v54, 0.0  ;;  %1555 = sbr.rel (%p1880_p6) target bundleno = 2568 (0xa08), region = 88 }
 0x854   : > { %v1545_v6 = vadd.f32 %v1539_v58, %v2666_v61 }
 0x856   : > { %1551 = vst [vmem:[#allocation7 + $0x28] sm:$0xff] %v1545_v6 }
 0x857   : > { %v2316_v59 = vmov 0   ;;  %v2317_v7 = vmov 0.0   ;;  %v1664_v60 = vld [vmem:[%s2850_s6] sm:$0xff]  ;;  %vm2318_vm4 = vmmov 0  }
 0x858   : > { %2181 = vset.pattern.permute.xlu1 %v2316_v59  ;;  %2180 = vset.pattern.permute.xlu0 %v2316_v59 }
 0x859   : > { %1569 = vperm.xlu1 %2181, %v2481_v2   ;;  %1563 = vperm.xlu0 %2180, %v2471_v0   ;;  %v1560_v61 = vld [vmem:[#allocation7 + $0x20] sm:$0xff]  ;;  %v1558_v2 = vld [vmem:[#allocation7 + $0x10] sm:$0xff]  ;;  %v1665_v0 = vld [vmem:[%s2850_s6 + $0x8] sm:$0xff] }
 0x85a   : > { %2094 = vmatprep.subr.bf16.mxu0 %v2317_v7  ;;  %2100 = vmatprep.mubr.msk.bf16.mxu0 %vm2318_vm4, %v2317_v7 }
 0x85d   : > { %1572 = vperm.xlu1 %2181, %v2486_v3   ;;  %1566 = vperm.xlu0 %2180, %v2476_v1   ;;  %v1561_v63 = vld [vmem:[#allocation7 + $0x28] sm:$0xff]  ;;  %v1559_v3 = vld [vmem:[#allocation7 + $0x18] sm:$0xff] }
 0x85e   : > { %v1603_v10 = vpack.c.bf16 %v1561_v63, %v1560_v61  ;;  %v1602_v1 = vpack.c.bf16 %v1559_v3, %v1558_v2 }
 0x860   : > { %2095 = vmatpush3.bf16.msra.mxu0 %v1603_v10 }
 0x861   : > { %1578 = vperm.xlu1 %2181, %v2496_v5   ;;  %1575 = vperm.xlu0 %2180, %v2491_v4   ;;  %v1556_v4 = vld [vmem:[#allocation7] sm:$0xff]  ;;  %v1557_v5 = vld [vmem:[#allocation7 + $0x8] sm:$0xff] }
 0x862   : > { %2096 = vmatprep.subr.bf16.mxu0 %v2317_v7  ;;  %v1601_v12 = vpack.c.bf16 %v1557_v5, %v1556_v4 }
 0x864   : > { %2097 = vmatpush3.bf16.msra.mxu0 %v1602_v1 }
 0x865   : > { %1668 = vperm.xlu1 %2181, %v1664_v60   ;;  %2098 = vmatprep.subr.bf16.mxu0 %v2317_v7 }
 0x868   : > { %2099 = vmatpush3.bf16.msra.mxu0 %v1601_v12 }
 0x869   : > { %1673 = vperm.xlu1 %2181, %v1665_v0  }
 0x8d4   : > { %v1570_v13 = vpop.permute.xlu1 %1569  ;;  %v1564_v14 = vpop.permute.xlu0 %1563 }
 0x8d5   : > { %vm1580_vm6 = vcmp.eq.s32.totalorder %v1564_v14, %v2713_v31  ;;  %vm1582_vm7 = vcmp.eq.s32.totalorder %v1570_v13, %v2713_v31 }
 0x8d6   : > { %v1881_v17 = vsel %vm1580_vm6, 1.0, %v2317_v7  ;;  %v1883_v21 = vsel %vm1582_vm7, 1.0, %v2317_v7 }
 0x8d8   : > { %v1573_v15 = vpop.permute.xlu1 %1572  ;;  %v1567_v16 = vpop.permute.xlu0 %1566 }
 0x8d9   : > { %vm1583_vm8 = vcmp.eq.s32.totalorder %v1573_v15, %v2713_v31  ;;  %vm1581_vm9 = vcmp.eq.s32.totalorder %v1567_v16, %v2713_v31 }
 0x8da   : > { %v1882_v18 = vsel %vm1581_vm9, 1.0, %v2317_v7  ;;  %v1884_v25 = vsel %vm1583_vm8, 1.0, %v2317_v7 }
 0x8db   : > { %v1598_v20 = vpack.c.bf16 %v1882_v18, %v1881_v17  ;;  %v1599_v32 = vpack.c.bf16 %v1884_v25, %v1883_v21 }
 0x8dc   : > { %v1579_v27 = vpop.permute.xlu1 %1578  ;;  %v1576_v30 = vpop.permute.xlu0 %1575 }
 0x8dd   : > { %vm1585_vm10 = vcmp.eq.s32.totalorder %v1579_v27, %v2713_v31  ;;  %vm1584_vm11 = vcmp.eq.s32.totalorder %v1576_v30, %v2713_v31  ;;  %1604 = vxpose.xlu0.c.b16.start [1/3] (short) (narrow) %v1598_v20, 16 }
 0x8de   : > { %v1886_v33 = vsel %vm1585_vm10, 1.0, %v2317_v7  ;;  %v1885_v34 = vsel %vm1584_vm11, 1.0, %v2317_v7 }
 0x8df   : > { %v1600_v26 = vpack.c.bf16 %v1886_v33, %v1885_v34 }
 0x8e0   : > { %v1669_v23 = vpop.permute.xlu1 %1668 }
 0x8e1   : > { %1605 = vxpose.xlu0.c.b16.cont [2/3] (short) (narrow) %v1599_v32, 16 }
 0x8e4   : > { %v1674_v28 = vpop.permute.xlu1 %1673 }
 0x8e5   : > { %1606 = vxpose.xlu0.c.b16.end [3/3] (short) (narrow) %v1600_v26, 16 }
 0x93f   : > { %v1612_v22 = vpop.trf.xlu0 }
 0x940   : > { %2101 = vmatmul.mubr.msk.bf16.vlgmr.msra.gmra.mxu0 %vm1224_vm5, %v1612_v22 }
 0xa00   : > { %v1657_v24 = vpop.f32.mrf.mxu0 }
 0xa01   : > { %v1676_v29 = vmul.f32 %v1669_v23, %v1657_v24 }
 0xa02   : > { %v2102_v35 = vpop.f32.mrf.mxu0 }
 0xa03   : > { %1678 = vst [vmem:[#allocation8] sm:$0xff] %v1676_v29 }
 0xa04   : > { %v1660_v36 = vpop.f32.mrf.mxu0 }
 0xa05   : > { %v1677_v37 = vmul.f32 %v1674_v28, %v1660_v36 }
 0xa06   : > { %v2103_v38 = vpop.f32.mrf.mxu0 }
 0xa07   : > { %1679 = vst [vmem:[#allocation8 + $0x8] sm:$0xff] %v1677_v37 }
 0xa08 PF: > { %p2131_p7 = scmp.eq.s32.totalorder %s2399_s26, 1  ;;  %s2319_s17 = smov [#allocation7]  }
 0xa09   : > { %s1686_s18 = sshll.u32 %s2319_s17, 4  ;;  %s1687_s18 = int_to_ptr.vmem [resolvable:$true] %s1686_s18 }
 0xa0a   : > { %s2234_s20 = scalar_lea.vmem %s1687_s18, 768  ;;  %p2241_p1 = scmp.lt.s32.totalorder %s1687_s18, %s1687_s18 }
 0xa0b   : > { %p2235_p12 = scmp.ne.s32.totalorder %s1687_s18, %s2234_s20  ;;  %p2242_p5 = scmp.lt.s32.totalorder %s2234_s20, %s2234_s20 }
 0xa0d   : > { %p2236_p13 = pnand %p2235_p12, %p2131_p7  ;;  %p2243_p8 = por %p2242_p5, %p2241_p1 }
 0xa0f   : > { %p2237_p0 = pneg %p2236_p13 }
 0xa11   : > { %p2244_p9 = pnand %p2243_p8, %p2237_p0 }
 0xa13   : > { %2247 = shalt.err (!%p2244_p9)
}
 0xa14   : > { %s2320_s19 = smov 128   ;;  %s2321_s0 = smov 8  }
 0xa15   : > { %2113 = dma.vmem_to_hbm [thread:$0]  (%p2131_p7), %s1687_s18, 768, %s2856_s12, [#allocation4], %s2320_s19, %s2320_s19, %s2321_s0  }
 0xa16   : > { %s2322_s30 = smov [#allocation8]  }
 0xa17   : > { %s1699_s23 = sshll.u32 %s2322_s30, 4  ;;  %s1700_s23 = int_to_ptr.vmem [resolvable:$true] %s1699_s23 }
 0xa18   : > { %s2258_s16 = scalar_lea.vmem %s1700_s23, 256  ;;  %p2265_p3 = scmp.lt.s32.totalorder %s1700_s23, %s1700_s23 }
 0xa19   : > { %p2259_p11 = scmp.ne.s32.totalorder %s1700_s23, %s2258_s16  ;;  %p2266_p4 = scmp.lt.s32.totalorder %s2258_s16, %s2258_s16 }
 0xa1b   : > { %p2260_p10 = pnand %p2259_p11, %p2131_p7  ;;  %p2267_p6 = por %p2266_p4, %p2265_p3 }
 0xa1d   : > { %p2261_p2 = pneg %p2260_p10 }
 0xa1f   : > { %p2268_p12 = pnand %p2267_p6, %p2261_p2 }
 0xa21   : > { %2271 = shalt.err (!%p2268_p12)
}
 0xa22   : > { %2115 = dma.vmem_to_hbm [thread:$0]  (%p2131_p7), %s1700_s23, 256, %s2857_s13, [#allocation9], %s2320_s19, %s2320_s19, %s2321_s0  }
 0xa23   : > { %2295 = dma.done.wait (%p2131_p7), [#allocation4], 768  }
 0xa24   : > { %2297 = vsyncadd (%p2131_p7), [#allocation4], 4294966528 }
 0xa25   : > { %2299 = dma.done.wait (%p2131_p7), [#allocation9], 256  }
 0xa26   : > { %2301 = vsyncadd (%p2131_p7), [#allocation9], 4294967040 }
 0xa27 PF: > { %s28_s25 = sadd.s32 1, %s2304_s25  }
 0xa28   : > { %p25_p13 = scmp.ge.s32.totalorder %s28_s25, 4  }
 0xa2a   :  { %27 = sbr.rel (!%p25_p13) target bundleno = 6 (0x6), region = 133 }
 0xa2f   :  { %1719 = vsyncpa [#allocation3], 1 }
 0xa30   :  { %1721 = vsyncpa [#allocation3 + $0x1], 1 }
 0xa31   :  { %1722 = vsyncpa [#allocation6], 1 }
 0xa32   :  { %1723 = vsyncpa [#allocation4], 1 }
 0xa33   :  { %1725 = vsyncpa [#allocation4 + $0x1], 1 }
 0xa34   :  { %1726 = vsyncpa [#allocation9], 1 }

</bundles_post_ra>
